<compile_context>
chip_gen: v5e
topology: v5e:2x2
jax: 0.10.0
libtpu: 0.0.40
codegen_flags: <defaults>
</compile_context>

<pallas_src>
import functools

import jax
import jax.numpy as jnp
from jax import lax
from jax.experimental import pallas as pl
from jax.experimental.pallas import tpu as pltpu


def _round_up(x, m):
    return ((x + m - 1) // m) * m


def _choose_tiling(n):
    """Pick (n_pad, dst_tile, src_tile) so that both tiles divide n_pad.

    Tiles are sized so useful per-step work dominates the ~0.35us per-grid-step
    overhead (512 x 1024 int8 A tiles when the graph is big enough)."""
    if n <= 512:
        n_pad = _round_up(n, 128)
        return n_pad, n_pad, n_pad
    n_pad = _round_up(n, 512)
    ti = 512
    tk = 1024 if n_pad % 1024 == 0 else 512
    return n_pad, ti, tk


def _device_vmem_bytes():
    try:
        return int(pltpu.get_tpu_info().vmem_capacity_bytes)
    except Exception:
        return 64 * 2 ** 20          # conservative fallback (v7x per-TC VMEM)


def _rtag_kernel(a_ref, x_ref, norm_ref, w0_ref, wh_ref, b_ref,   # inputs
                 o_ref,                                           # output
                 g_ref, acc_ref,                                  # VMEM scratch
                 *, n_pad, ti, tk, radius, use_relu, a_resident):
    # NOTE: the hop / dst-tile / src-tile grid axes MUST stay "arbitrary"
    # (sequential, row-major): g_ref, acc_ref and the resident output block carry
    # state across them.  Only the relation axis may be "parallel".
    hh = pl.program_id(1)            # hop index: this pass computes f_{hh+1}
    ii = pl.program_id(2)            # dst-row tile
    kk = pl.program_id(3)            # src (contraction) tile
    nk = pl.num_programs(3)

    dst = pl.multiple_of(ii * ti, ti)

    # ---- distributed per-relation init: g_0 = norm * x, seeded one src tile per
    #      step while the first dst tile of hop 0 is processed (no monolithic burst).
    @pl.when((hh == 0) & (ii == 0))
    def _seed_g0_tile():
        src = pl.multiple_of(kk * tk, tk)
        g_ref[pl.ds(src, tk), :] = (
            x_ref[pl.ds(src, tk), :] * norm_ref[0, pl.ds(src, tk), :]
        ).astype(g_ref.dtype)

    # ---- src-tile contraction: acc += A[dst_tile, src_tile] @ g_prev[src_tile] ----
    @pl.when(kk == 0)
    def _zero_acc():
        acc_ref[...] = jnp.zeros_like(acc_ref)

    # Direct int8 (0/1) -> bf16 cast (exact).  A is stored as A[dst, src], so the MXU
    # feed is a plain last-dim contraction (no per-tile transpose on the hot path).
    if a_resident:
        a_tile = a_ref[0, pl.ds(dst, ti), :].astype(jnp.bfloat16)       # (ti, n_pad)
    else:
        a_tile = a_ref[0].astype(jnp.bfloat16)                          # (ti, tk)
    src_off = pl.multiple_of((hh % 2) * n_pad + kk * tk, tk)
    g_src = g_ref[pl.ds(src_off, tk), :]                                # (tk, F) bf16
    acc_ref[...] += jnp.dot(a_tile, g_src,
                            preferred_element_type=jnp.float32)         # (ti, F) f32

    # ---- finalize this (hop, dst-tile): symmetric norm, per-hop projection into the
    #      resident output block, next hop's pre-scaled source, distributed ReLU. ----
    @pl.when(kk == nk - 1)
    def _finalize_tile():
        norm_i = norm_ref[0, pl.ds(dst, ti), :]              # (ti, 1) f32
        f_new = acc_ref[...] * norm_i                        # f_{hh+1}, this dst tile
        hop_proj = jnp.dot(f_new.astype(jnp.bfloat16), wh_ref[0, 0],
                           preferred_element_type=jnp.float32)

        @pl.when(hh == 0)
        def _init_out_tile():        # hop-0 projection folded in here (distributed)
            x_tile = x_ref[pl.ds(dst, ti), :].astype(jnp.bfloat16)
            o_ref[0, pl.ds(dst, ti), :] = (
                jnp.dot(x_tile, w0_ref[0], preferred_element_type=jnp.float32)
                + b_ref[0] + hop_proj)

        @pl.when(hh > 0)
        def _acc_out_tile():
            o_ref[0, pl.ds(dst, ti), :] += hop_proj

        @pl.when(hh + 1 < radius)     # the last hop's g slab is never read: skip it
        def _write_next_g():
            nxt = pl.multiple_of(((hh + 1) % 2) * n_pad + dst, ti)
            g_ref[pl.ds(nxt, ti), :] = (f_new * norm_i).astype(g_ref.dtype)

        if use_relu:
            @pl.when(hh == radius - 1)
            def _relu_tile():
                o_ref[0, pl.ds(dst, ti), :] = jnp.maximum(
                    o_ref[0, pl.ds(dst, ti), :], 0.0)


def _relational_tagconv_call(a_i8, x_pad, norm, w0, wh, b, *, radius, use_relu,
                             ti, tk):
    """a_i8: (R, N_pad, N_pad) int8 A[dst, src]; x_pad: (N_pad, F) f32;
    norm: (R, N_pad, 1) f32; w0: (R, F, Wp) bf16; wh: (R, radius, F, Wp) bf16;
    b: (R, 1, Wp) f32."""
    R, n_pad, _ = a_i8.shape
    F = x_pad.shape[1]
    wp = w0.shape[-1]

    device_vmem = _device_vmem_bytes()

    # Resident footprint estimate (x2 for BlockSpec double-buffering of the
    # constant-index blocks), excluding the adjacency.
    resident_bytes = (2 * n_pad * wp * 4                 # resident output block
                      + 2 * n_pad * F * 4                # resident x
                      + 2 * n_pad * 4                    # norm
                      + 2 * n_pad * F * 2                # bf16 g ping-pong scratch
                      + ti * F * 4                       # contraction accumulator
                      + 4 * F * wp * 2 * (radius + 1)    # weights (bf16)
                      + 2 * wp * 4)                      # bias

    # Keep the whole per-relation adjacency VMEM-resident when it fits: A is the
    # dominant HBM traffic and would otherwise be re-read `radius` times.
    a_resident = (radius > 1
                  and 2 * n_pad * n_pad + resident_bytes <= int(0.5 * device_vmem))
    if a_resident:
        tk = n_pad

    ni = n_pad // ti
    nk = n_pad // tk
    grid = (R, radius, ni, nk)

    kernel = functools.partial(_rtag_kernel, n_pad=n_pad, ti=ti, tk=tk,
                               radius=radius, use_relu=use_relu,
                               a_resident=a_resident)

    if a_resident:
        a_spec = pl.BlockSpec((1, n_pad, n_pad), lambda r, h, i, k: (r, 0, 0))
        a_bytes_hbm = R * n_pad * n_pad
        a_vmem = 2 * n_pad * n_pad
    else:
        # TODO(synk): on v5e consider pipeline_mode=pl.Buffered(3) here; on v7x
        # consider pl.Buffered(1) on the constant-index resident specs.
        a_spec = pl.BlockSpec((1, ti, tk), lambda r, h, i, k: (r, i, k))
        a_bytes_hbm = R * radius * n_pad * n_pad
        a_vmem = 3 * ti * tk

    flops = int(2 * R * radius * n_pad * n_pad * F
                + 2 * R * (radius + 1) * n_pad * F * wp)
    bytes_accessed = int(a_bytes_hbm
                         + (x_pad.size + norm.size + b.size) * 4
                         + (w0.size + wh.size) * 2
                         + R * n_pad * wp * 4)

    vmem_cap = max(32 * 2 ** 20, device_vmem - 8 * 2 ** 20)
    vmem_limit = int(min(vmem_cap,
                         max(32 * 2 ** 20, 2 * (a_vmem + resident_bytes))))

    return pl.pallas_call(
        kernel,
        out_shape=jax.ShapeDtypeStruct((R, n_pad, wp), jnp.float32),
        grid_spec=pltpu.PrefetchScalarGridSpec(
            num_scalar_prefetch=0,
            grid=grid,
            in_specs=[
                # adjacency A[dst, src] as int8 (resident per relation, or streamed
                # tiled (dst=ti, src=tk))
                a_spec,
                # node features: resident for the whole call
                pl.BlockSpec((n_pad, F), lambda r, h, i, k: (0, 0)),
                # per-relation symmetric-norm vector: resident per relation
                pl.BlockSpec((1, n_pad, 1), lambda r, h, i, k: (r, 0, 0)),
                # hop-0 projection weights (bf16, resident per relation)
                pl.BlockSpec((1, F, wp), lambda r, h, i, k: (r, 0, 0)),
                # per-hop projection weights (bf16), swapped in by the hop grid index
                pl.BlockSpec((1, 1, F, wp), lambda r, h, i, k: (r, h, 0, 0)),
                # bias (f32)
                pl.BlockSpec((1, 1, wp), lambda r, h, i, k: (r, 0, 0)),
            ],
            # lane-dense (Wp >= 128) output block, resident per relation
            out_specs=pl.BlockSpec((1, n_pad, wp), lambda r, h, i, k: (r, 0, 0)),
            scratch_shapes=[
                pltpu.VMEM((2 * n_pad, F), jnp.bfloat16),  # norm-scaled f ping-pong
                pltpu.VMEM((ti, F), jnp.float32),          # src-tile accumulator
            ],
        ),
        compiler_params=pltpu.CompilerParams(
            dimension_semantics=("parallel", "arbitrary", "arbitrary", "arbitrary"),
            vmem_limit_bytes=vmem_limit),
        cost_estimate=pl.CostEstimate(flops=flops, transcendentals=0,
                                      bytes_accessed=bytes_accessed),
    )(a_i8, x_pad, norm, w0, wh, b)


class RelationalTAGConvPallas:
    """Mirror of RelationalTAGConv: one TAGConv per boolean edge relation, outputs
    concatenated along the feature dim. All relations run in one fused pallas_call."""

    def __init__(self, *, radius, width_in, use_relu=True, key,
                 **attribute_output_widths):
        assert radius >= 1, "radius must be >= 1"
        # TODO(synk): radius == 0 degenerates to a plain Linear; not handled here.
        self.radius = radius
        self.use_relu = use_relu
        self.width_in = width_in
        self.names = list(attribute_output_widths.keys())
        self.widths = [attribute_output_widths[n] for n in self.names]

        fan_in = width_in * (radius + 1)
        bound = 1.0 / float(fan_in) ** 0.5
        self.params = {}
        for name, width_out in attribute_output_widths.items():
            key, kw, kb = jax.random.split(key, 3)
            # nn.Linear(fan_in, width_out): weight (width_out, fan_in), bias (width_out,)
            w = jax.random.uniform(kw, (width_out, fan_in), jnp.float32, -bound, bound)
            b = jax.random.uniform(kb, (width_out,), jnp.float32, -bound, bound)
            self.params[name] = (w, b)

        # Pre-pack weights once: per-hop (F, Wp) blocks, zero-padded to a lane-dense
        # common output width Wp >= 128, pre-cast to bf16 (they are only ever MXU
        # operands); real widths are sliced out in the wrapper.  Bias stays f32.
        self.wp = max(128, _round_up(max(self.widths), 128))
        w0_blocks, wh_blocks, b_blocks = [], [], []
        for name in self.names:
            w, b = self.params[name]
            wt = jnp.zeros((fan_in, self.wp), jnp.float32).at[:, :w.shape[0]].set(w.T)
            wt = wt.reshape(radius + 1, width_in, self.wp)
            w0_blocks.append(wt[0])
            wh_blocks.append(wt[1:])
            b_blocks.append(
                jnp.zeros((1, self.wp), jnp.float32).at[0, :b.shape[0]].set(b))
        self.w0_stack = jnp.stack(w0_blocks).astype(jnp.bfloat16)   # (R, F, Wp)
        self.wh_stack = jnp.stack(wh_blocks).astype(jnp.bfloat16)   # (R, radius, F, Wp)
        self.b_stack = jnp.stack(b_blocks)                          # (R, 1, Wp) f32

    def __call__(self, adj_by_relation, x):
        N, F = x.shape
        assert F == self.width_in
        # TODO(synk): on v6e/v7x, padding F up to 128 (x columns + W rows) would make
        # the propagation matmul / g stores lane-dense; skipped here (measure both).
        n_pad, ti, tk = _choose_tiling(N)

        # A[dst, src]: one cheap XLA transpose per relation so the in-kernel MXU feed
        # is a plain last-dim contraction; streamed as int8 (cast to bf16 per tile
        # inside the kernel).
        a = jnp.stack([jnp.asarray(adj_by_relation[n], jnp.int8).T
                       for n in self.names])
        a = jnp.pad(a, ((0, 0), (0, n_pad - N), (0, n_pad - N)))

        # Symmetric-norm vector (in-degree of each dst node), tiny XLA reduction.
        deg = jnp.sum(a, axis=2, dtype=jnp.float32)
        norm = lax.rsqrt(jnp.maximum(deg, 1.0))[..., None]     # (R, n_pad, 1)

        x_pad = jnp.pad(x.astype(jnp.float32), ((0, n_pad - N), (0, 0)))

        out = _relational_tagconv_call(
            a, x_pad, norm, self.w0_stack, self.wh_stack, self.b_stack,
            radius=self.radius, use_relu=self.use_relu, ti=ti, tk=tk)

        # Slice away the node and lane padding and concatenate per-relation outputs.
        return jnp.concatenate(
            [out[r, :N, :w] for r, w in enumerate(self.widths)], axis=1)

    # pure-JAX reference mirroring the kernel numerics (bf16 MXU operands, f32 accum)
    def reference(self, adj_by_relation, x):
        def _bf16(v):
            return v.astype(jnp.bfloat16).astype(jnp.float32)

        outs = []
        for name in self.names:
            w, b = self.params[name]
            a = jnp.asarray(adj_by_relation[name], jnp.float32)   # A[src, dst]
            deg = jnp.sum(a, axis=0)[:, None]                     # in-degree
            norm = lax.rsqrt(jnp.maximum(deg, 1.0))
            f = x
            fstack = [f]
            for _ in range(self.radius):
                g = _bf16(f * norm)
                f = jnp.dot(a.T, g, precision=lax.Precision.HIGHEST,
                            preferred_element_type=jnp.float32) * norm
                fstack.append(f)
            feats = _bf16(jnp.concatenate(fstack, axis=1))
            o = jnp.dot(feats, _bf16(w.T), precision=lax.Precision.HIGHEST,
                        preferred_element_type=jnp.float32) + b
            if self.use_relu:
                o = jnp.maximum(o, 0.0)
            outs.append(o)
        return jnp.concatenate(outs, axis=1)


if __name__ == "__main__":
    key = jax.random.PRNGKey(0)
    N = 128            # nodes
    WIDTH_IN = 32      # input node-feature width
    RADIUS = 2

    key, kx, ka, kb_ = jax.random.split(key, 4)
    x = jax.random.normal(kx, (N, WIDTH_IN), jnp.float32)
    # per-relation boolean adjacency (the relation's edge-subgraph, nodes preserved)
    adj = {
        "rel_a": jax.random.bernoulli(ka, 0.10, (N, N)),
        "rel_b": jax.random.bernoulli(kb_, 0.05, (N, N)),
    }

    key, kparams = jax.random.split(key)
    model = RelationalTAGConvPallas(
        radius=RADIUS, width_in=WIDTH_IN, use_relu=True, key=kparams,
        rel_a=16, rel_b=8)

    out = jax.block_until_ready(model(adj, x))
    ref = jax.block_until_ready(model.reference(adj, x))

    assert out.shape == (N, 16 + 8), out.shape
    # bf16 MXU operands with f32 accumulation: differences vs the mirrored reference
    # come only from accumulation order (and rare 1-ulp bf16 requantization flips).
    err = float(jnp.max(jnp.abs(out - ref)))
    assert jnp.allclose(out, ref, atol=3e-3, rtol=3e-3), err

    print("KERNEL_OK")
</pallas_src>

<mosaic_0001>
module attributes {stable_mosaic.version = 11 : i64} {
  func.func @_rtag_kernel(%arg0: i32, %arg1: i32, %arg2: i32, %arg3: i32, %arg4: memref<1x128x128xi8, #tpu.memory_space<vmem>>, %arg5: memref<128x32xf32, #tpu.memory_space<vmem>>, %arg6: memref<1x128x1xf32, #tpu.memory_space<vmem>>, %arg7: memref<1x32x128xbf16, #tpu.memory_space<vmem>>, %arg8: memref<1x1x32x128xbf16, #tpu.memory_space<vmem>>, %arg9: memref<1x1x128xf32, #tpu.memory_space<vmem>>, %arg10: memref<1x128x128xf32, #tpu.memory_space<vmem>>, %arg11: memref<256x32xbf16, #tpu.memory_space<vmem>>, %arg12: memref<128x32xf32, #tpu.memory_space<vmem>>) attributes {dimension_semantics = [#tpu.dimension_semantics<parallel>, #tpu.dimension_semantics<arbitrary>, #tpu.dimension_semantics<arbitrary>, #tpu.dimension_semantics<arbitrary>], iteration_bounds = array<i64: 2, 2, 1, 1>, scalar_prefetch = 0 : i64, scratch_operands = 2 : i64, tpu.core_type = #tpu.core_type<tc>, window_params = [{transform_indices = @transform_0, window_bounds = array<i64: 1, 128, 128>}, {pipeline_mode = #tpu.pipeline_mode<synchronous>, transform_indices = @transform_1, window_bounds = array<i64: 128, 32>}, {transform_indices = @transform_2, window_bounds = array<i64: 1, 128, 1>}, {transform_indices = @transform_3, window_bounds = array<i64: 1, 32, 128>}, {transform_indices = @transform_4, window_bounds = array<i64: 1, 1, 32, 128>}, {transform_indices = @transform_5, window_bounds = array<i64: 1, 1, 128>}, {transform_indices = @transform_6, window_bounds = array<i64: 1, 128, 128>}]} {
    %c128_i32 = arith.constant 128 : i32
    %0 = arith.muli %arg2, %c128_i32 : i32
    %1 = tpu.assume_multiple %0, 128 : i32
    %c0_i32 = arith.constant 0 : i32
    %2 = arith.cmpi eq, %arg1, %c0_i32 : i32
    %c0_i32_0 = arith.constant 0 : i32
    %3 = arith.cmpi eq, %arg2, %c0_i32_0 : i32
    %4 = arith.andi %2, %3 : i1
    %5 = arith.extui %4 : i1 to i32
    %c0_i32_1 = arith.constant 0 : i32
    %6 = arith.cmpi ne, %5, %c0_i32_1 : i32
    scf.if %6 {
      %c128_i32_18 = arith.constant 128 : i32
      %37 = arith.muli %arg3, %c128_i32_18 : i32
      %38 = tpu.assume_multiple %37, 128 : i32
      %39 = arith.index_cast %38 : i32 to index
      %c0_19 = arith.constant 0 : index
      %40 = vector.load %arg5[%39, %c0_19] : memref<128x32xf32, #tpu.memory_space<vmem>>, vector<128x32xf32>
      %c0_20 = arith.constant 0 : index
      %41 = arith.index_cast %38 : i32 to index
      %c0_21 = arith.constant 0 : index
      %42 = vector.load %arg6[%c0_20, %41, %c0_21] : memref<1x128x1xf32, #tpu.memory_space<vmem>>, vector<1x128x1xf32>
      %43 = vector.shape_cast %42 : vector<1x128x1xf32> to vector<128x1xf32>
      %44 = vector.broadcast %43 : vector<128x1xf32> to vector<128x32xf32>
      %45 = arith.mulf %40, %44 : vector<128x32xf32>
      %46 = arith.truncf %45 : vector<128x32xf32> to vector<128x32xbf16>
      %47 = arith.index_cast %38 : i32 to index
      %c0_22 = arith.constant 0 : index
      %48 = vector.load %arg11[%47, %c0_22] : memref<256x32xbf16, #tpu.memory_space<vmem>>, vector<128x32xbf16>
      tpu.vector_store %arg11[%47, %c0_22], %46 {strides = array<i32>} : memref<256x32xbf16, #tpu.memory_space<vmem>>, vector<128x32xbf16>,
    } else {
    }
    %c0_i32_2 = arith.constant 0 : i32
    %7 = arith.cmpi eq, %arg3, %c0_i32_2 : i32
    %8 = arith.extui %7 : i1 to i32
    %c0_i32_3 = arith.constant 0 : i32
    %9 = arith.cmpi ne, %8, %c0_i32_3 : i32
    scf.if %9 {
      %cst_18 = arith.constant 0.000000e+00 : f32
      %37 = vector.broadcast %cst_18 : f32 to vector<128x32xf32>
      %c0_19 = arith.constant 0 : index
      %c0_20 = arith.constant 0 : index
      %38 = vector.load %arg12[%c0_19, %c0_20] : memref<128x32xf32, #tpu.memory_space<vmem>>, vector<128x32xf32>
      tpu.vector_store %arg12[%c0_19, %c0_20], %37 {strides = array<i32>} : memref<128x32xf32, #tpu.memory_space<vmem>>, vector<128x32xf32>,
    } else {
    }
    %c0 = arith.constant 0 : index
    %10 = arith.index_cast %1 : i32 to index
    %c0_4 = arith.constant 0 : index
    %11 = vector.load %arg4[%c0, %10, %c0_4] : memref<1x128x128xi8, #tpu.memory_space<vmem>>, vector<1x128x128xi8>
    %12 = vector.shape_cast %11 : vector<1x128x128xi8> to vector<128x128xi8>
    %13 = arith.sitofp %12 : vector<128x128xi8> to vector<128x128xbf16>
    %c2_i32 = arith.constant 2 : i32
    %c0_i32_5 = arith.constant 0 : i32
    %14 = arith.cmpi eq, %c2_i32, %c0_i32_5 : i32
    %c1_i32 = arith.constant 1 : i32
    %15 = arith.select %14, %c1_i32, %c2_i32 : i32
    %16 = arith.remsi %arg1, %15 : i32
    %c0_i32_6 = arith.constant 0 : i32
    %17 = arith.cmpi ne, %16, %c0_i32_6 : i32
    %c0_i32_7 = arith.constant 0 : i32
    %18 = arith.cmpi slt, %16, %c0_i32_7 : i32
    %c0_i32_8 = arith.constant 0 : i32
    %19 = arith.cmpi slt, %15, %c0_i32_8 : i32
    %20 = arith.xori %18, %19 : i1
    %21 = arith.andi %20, %17 : i1
    %22 = arith.addi %16, %15 : i32
    %23 = arith.select %21, %22, %16 : i32
    %c128_i32_9 = arith.constant 128 : i32
    %24 = arith.muli %23, %c128_i32_9 : i32
    %c128_i32_10 = arith.constant 128 : i32
    %25 = arith.muli %arg3, %c128_i32_10 : i32
    %26 = arith.addi %24, %25 : i32
    %27 = tpu.assume_multiple %26, 128 : i32
    %28 = arith.index_cast %27 : i32 to index
    %c0_11 = arith.constant 0 : index
    %29 = vector.load %arg11[%28, %c0_11] : memref<256x32xbf16, #tpu.memory_space<vmem>>, vector<128x32xbf16>
    %c0_12 = arith.constant 0 : index
    %c0_13 = arith.constant 0 : index
    %30 = vector.load %arg12[%c0_12, %c0_13] : memref<128x32xf32, #tpu.memory_space<vmem>>, vector<128x32xf32>
    %cst = arith.constant dense<0.000000e+00> : vector<128x32xf32>
    %31 = tpu.matmul %13, %29, %cst {dimension_numbers = #tpu.dot_dimension_numbers<[1], [0], [0], [1], [0, 0, 1, 1], [], []>} : vector<128x128xbf16>, vector<128x32xbf16>, vector<128x32xf32> -> vector<128x32xf32>
    %32 = arith.addf %30, %31 : vector<128x32xf32>
    %c0_14 = arith.constant 0 : index
    %c0_15 = arith.constant 0 : index
    %33 = vector.load %arg12[%c0_14, %c0_15] : memref<128x32xf32, #tpu.memory_space<vmem>>, vector<128x32xf32>
    tpu.vector_store %arg12[%c0_14, %c0_15], %32 {strides = array<i32>} : memref<128x32xf32, #tpu.memory_space<vmem>>, vector<128x32xf32>,
    %c0_i32_16 = arith.constant 0 : i32
    %34 = arith.cmpi eq, %arg3, %c0_i32_16 : i32
    %35 = arith.extui %34 : i1 to i32
    %c0_i32_17 = arith.constant 0 : i32
    %36 = arith.cmpi ne, %35, %c0_i32_17 : i32
    scf.if %36 {
      %c0_18 = arith.constant 0 : index
      %37 = arith.index_cast %1 : i32 to index
      %c0_19 = arith.constant 0 : index
      %38 = vector.load %arg6[%c0_18, %37, %c0_19] : memref<1x128x1xf32, #tpu.memory_space<vmem>>, vector<1x128x1xf32>
      %39 = vector.shape_cast %38 : vector<1x128x1xf32> to vector<128x1xf32>
      %c0_20 = arith.constant 0 : index
      %c0_21 = arith.constant 0 : index
      %40 = vector.load %arg12[%c0_20, %c0_21] : memref<128x32xf32, #tpu.memory_space<vmem>>, vector<128x32xf32>
      %41 = vector.broadcast %39 : vector<128x1xf32> to vector<128x32xf32>
      %42 = arith.mulf %40, %41 : vector<128x32xf32>
      %43 = arith.truncf %42 : vector<128x32xf32> to vector<128x32xbf16>
      %c0_22 = arith.constant 0 : index
      %c0_23 = arith.constant 0 : index
      %c0_24 = arith.constant 0 : index
      %c0_25 = arith.constant 0 : index
      %44 = vector.load %arg8[%c0_22, %c0_23, %c0_24, %c0_25] : memref<1x1x32x128xbf16, #tpu.memory_space<vmem>>, vector<1x1x32x128xbf16>
      %45 = vector.shape_cast %44 : vector<1x1x32x128xbf16> to vector<32x128xbf16>
      %cst_26 = arith.constant dense<0.000000e+00> : vector<128x128xf32>
      %46 = tpu.matmul %43, %45, %cst_26 {dimension_numbers = #tpu.dot_dimension_numbers<[1], [0], [0], [1], [0, 0, 1, 1], [], []>} : vector<128x32xbf16>, vector<32x128xbf16>, vector<128x128xf32> -> vector<128x128xf32>
      %c0_i32_27 = arith.constant 0 : i32
      %47 = arith.cmpi eq, %arg1, %c0_i32_27 : i32
      %48 = arith.extui %47 : i1 to i32
      %c0_i32_28 = arith.constant 0 : i32
      %49 = arith.cmpi ne, %48, %c0_i32_28 : i32
      scf.if %49 {
        %60 = arith.index_cast %1 : i32 to index
        %c0_36 = arith.constant 0 : index
        %61 = vector.load %arg5[%60, %c0_36] : memref<128x32xf32, #tpu.memory_space<vmem>>, vector<128x32xf32>
        %62 = arith.truncf %61 : vector<128x32xf32> to vector<128x32xbf16>
        %c0_37 = arith.constant 0 : index
        %c0_38 = arith.constant 0 : index
        %c0_39 = arith.constant 0 : index
        %63 = vector.load %arg7[%c0_37, %c0_38, %c0_39] : memref<1x32x128xbf16, #tpu.memory_space<vmem>>, vector<1x32x128xbf16>
        %64 = vector.shape_cast %63 : vector<1x32x128xbf16> to vector<32x128xbf16>
        %cst_40 = arith.constant dense<0.000000e+00> : vector<128x128xf32>
        %65 = tpu.matmul %62, %64, %cst_40 {dimension_numbers = #tpu.dot_dimension_numbers<[1], [0], [0], [1], [0, 0, 1, 1], [], []>} : vector<128x32xbf16>, vector<32x128xbf16>, vector<128x128xf32> -> vector<128x128xf32>
        %c0_41 = arith.constant 0 : index
        %c0_42 = arith.constant 0 : index
        %c0_43 = arith.constant 0 : index
        %66 = vector.load %arg9[%c0_41, %c0_42, %c0_43] : memref<1x1x128xf32, #tpu.memory_space<vmem>>, vector<1x1x128xf32>
        %67 = vector.shape_cast %66 : vector<1x1x128xf32> to vector<1x128xf32>
        %68 = vector.broadcast %67 : vector<1x128xf32> to vector<128x128xf32>
        %69 = arith.addf %65, %68 : vector<128x128xf32>
        %70 = arith.addf %69, %46 : vector<128x128xf32>
        %c0_44 = arith.constant 0 : index
        %71 = arith.index_cast %1 : i32 to index
        %c0_45 = arith.constant 0 : index
        %72 = vector.load %arg10[%c0_44, %71, %c0_45] : memref<1x128x128xf32, #tpu.memory_space<vmem>>, vector<1x128x128xf32>
        %73 = vector.shape_cast %72 : vector<1x128x128xf32> to vector<128x128xf32>
        %74 = vector.shape_cast %70 : vector<128x128xf32> to vector<1x128x128xf32>
        tpu.vector_store %arg10[%c0_44, %71, %c0_45], %74 {strides = array<i32>} : memref<1x128x128xf32, #tpu.memory_space<vmem>>, vector<1x128x128xf32>,
      } else {
      }
      %c0_i32_29 = arith.constant 0 : i32
      %50 = arith.cmpi sgt, %arg1, %c0_i32_29 : i32
      %51 = arith.extui %50 : i1 to i32
      %c0_i32_30 = arith.constant 0 : i32
      %52 = arith.cmpi ne, %51, %c0_i32_30 : i32
      scf.if %52 {
        %c0_36 = arith.constant 0 : index
        %60 = arith.index_cast %1 : i32 to index
        %c0_37 = arith.constant 0 : index
        %61 = vector.load %arg10[%c0_36, %60, %c0_37] : memref<1x128x128xf32, #tpu.memory_space<vmem>>, vector<1x128x128xf32>
        %62 = vector.shape_cast %61 : vector<1x128x128xf32> to vector<128x128xf32>
        %63 = arith.addf %62, %46 : vector<128x128xf32>
        %c0_38 = arith.constant 0 : index
        %64 = arith.index_cast %1 : i32 to index
        %c0_39 = arith.constant 0 : index
        %65 = vector.load %arg10[%c0_38, %64, %c0_39] : memref<1x128x128xf32, #tpu.memory_space<vmem>>, vector<1x128x128xf32>
        %66 = vector.shape_cast %65 : vector<1x128x128xf32> to vector<128x128xf32>
        %67 = vector.shape_cast %63 : vector<128x128xf32> to vector<1x128x128xf32>
        tpu.vector_store %arg10[%c0_38, %64, %c0_39], %67 {strides = array<i32>} : memref<1x128x128xf32, #tpu.memory_space<vmem>>, vector<1x128x128xf32>,
      } else {
      }
      %c1_i32_31 = arith.constant 1 : i32
      %53 = arith.addi %arg1, %c1_i32_31 : i32
      %c2_i32_32 = arith.constant 2 : i32
      %54 = arith.cmpi slt, %53, %c2_i32_32 : i32
      %55 = arith.extui %54 : i1 to i32
      %c0_i32_33 = arith.constant 0 : i32
      %56 = arith.cmpi ne, %55, %c0_i32_33 : i32
      scf.if %56 {
        %c1_i32_36 = arith.constant 1 : i32
        %60 = arith.addi %arg1, %c1_i32_36 : i32
        %c2_i32_37 = arith.constant 2 : i32
        %c0_i32_38 = arith.constant 0 : i32
        %61 = arith.cmpi eq, %c2_i32_37, %c0_i32_38 : i32
        %c1_i32_39 = arith.constant 1 : i32
        %62 = arith.select %61, %c1_i32_39, %c2_i32_37 : i32
        %63 = arith.remsi %60, %62 : i32
        %c0_i32_40 = arith.constant 0 : i32
        %64 = arith.cmpi ne, %63, %c0_i32_40 : i32
        %c0_i32_41 = arith.constant 0 : i32
        %65 = arith.cmpi slt, %63, %c0_i32_41 : i32
        %c0_i32_42 = arith.constant 0 : i32
        %66 = arith.cmpi slt, %62, %c0_i32_42 : i32
        %67 = arith.xori %65, %66 : i1
        %68 = arith.andi %67, %64 : i1
        %69 = arith.addi %63, %62 : i32
        %70 = arith.select %68, %69, %63 : i32
        %c128_i32_43 = arith.constant 128 : i32
        %71 = arith.muli %70, %c128_i32_43 : i32
        %72 = arith.addi %71, %1 : i32
        %73 = tpu.assume_multiple %72, 128 : i32
        %74 = vector.broadcast %39 : vector<128x1xf32> to vector<128x32xf32>
        %75 = arith.mulf %42, %74 : vector<128x32xf32>
        %76 = arith.truncf %75 : vector<128x32xf32> to vector<128x32xbf16>
        %77 = arith.index_cast %73 : i32 to index
        %c0_44 = arith.constant 0 : index
        %78 = vector.load %arg11[%77, %c0_44] : memref<256x32xbf16, #tpu.memory_space<vmem>>, vector<128x32xbf16>
        tpu.vector_store %arg11[%77, %c0_44], %76 {strides = array<i32>} : memref<256x32xbf16, #tpu.memory_space<vmem>>, vector<128x32xbf16>,
      } else {
      }
      %c1_i32_34 = arith.constant 1 : i32
      %57 = arith.cmpi eq, %arg1, %c1_i32_34 : i32
      %58 = arith.extui %57 : i1 to i32
      %c0_i32_35 = arith.constant 0 : i32
      %59 = arith.cmpi ne, %58, %c0_i32_35 : i32
      scf.if %59 {
        %c0_36 = arith.constant 0 : index
        %60 = arith.index_cast %1 : i32 to index
        %c0_37 = arith.constant 0 : index
        %61 = vector.load %arg10[%c0_36, %60, %c0_37] : memref<1x128x128xf32, #tpu.memory_space<vmem>>, vector<1x128x128xf32>
        %62 = vector.shape_cast %61 : vector<1x128x128xf32> to vector<128x128xf32>
        %cst_38 = arith.constant 0.000000e+00 : f32
        %63 = vector.broadcast %cst_38 : f32 to vector<128x128xf32>
        %64 = arith.maximumf %62, %63 : vector<128x128xf32>
        %c0_39 = arith.constant 0 : index
        %65 = arith.index_cast %1 : i32 to index
        %c0_40 = arith.constant 0 : index
        %66 = vector.load %arg10[%c0_39, %65, %c0_40] : memref<1x128x128xf32, #tpu.memory_space<vmem>>, vector<1x128x128xf32>
        %67 = vector.shape_cast %66 : vector<1x128x128xf32> to vector<128x128xf32>
        %68 = vector.shape_cast %64 : vector<128x128xf32> to vector<1x128x128xf32>
        tpu.vector_store %arg10[%c0_39, %65, %c0_40], %68 {strides = array<i32>} : memref<1x128x128xf32, #tpu.memory_space<vmem>>, vector<1x128x128xf32>,
      } else {
      }
    } else {
    }
    return
  }
  func.func @transform_0(%arg0: i32, %arg1: i32, %arg2: i32, %arg3: i32) -> (i32, i32, i32) {
    %c0_i32 = arith.constant 0 : i32
    %c0_i32_0 = arith.constant 0 : i32
    %c0_i32_1 = arith.constant 0 : i32
    return %arg0, %c0_i32, %c0_i32_0 : i32, i32, i32
  }
  func.func @transform_1(%arg0: i32, %arg1: i32, %arg2: i32, %arg3: i32) -> (i32, i32) {
    %c0_i32 = arith.constant 0 : i32
    %c0_i32_0 = arith.constant 0 : i32
    %c0_i32_1 = arith.constant 0 : i32
    return %c0_i32, %c0_i32_0 : i32, i32
  }
  func.func @transform_2(%arg0: i32, %arg1: i32, %arg2: i32, %arg3: i32) -> (i32, i32, i32) {
    %c0_i32 = arith.constant 0 : i32
    %c0_i32_0 = arith.constant 0 : i32
    %c0_i32_1 = arith.constant 0 : i32
    return %arg0, %c0_i32, %c0_i32_0 : i32, i32, i32
  }
  func.func @transform_3(%arg0: i32, %arg1: i32, %arg2: i32, %arg3: i32) -> (i32, i32, i32) {
    %c0_i32 = arith.constant 0 : i32
    %c0_i32_0 = arith.constant 0 : i32
    %c0_i32_1 = arith.constant 0 : i32
    return %arg0, %c0_i32, %c0_i32_0 : i32, i32, i32
  }
  func.func @transform_4(%arg0: i32, %arg1: i32, %arg2: i32, %arg3: i32) -> (i32, i32, i32, i32) {
    %c0_i32 = arith.constant 0 : i32
    %c0_i32_0 = arith.constant 0 : i32
    %c0_i32_1 = arith.constant 0 : i32
    return %arg0, %arg1, %c0_i32, %c0_i32_0 : i32, i32, i32, i32
  }
  func.func @transform_5(%arg0: i32, %arg1: i32, %arg2: i32, %arg3: i32) -> (i32, i32, i32) {
    %c0_i32 = arith.constant 0 : i32
    %c0_i32_0 = arith.constant 0 : i32
    %c0_i32_1 = arith.constant 0 : i32
    return %arg0, %c0_i32, %c0_i32_0 : i32, i32, i32
  }
  func.func @transform_6(%arg0: i32, %arg1: i32, %arg2: i32, %arg3: i32) -> (i32, i32, i32) {
    %c0_i32 = arith.constant 0 : i32
    %c0_i32_0 = arith.constant 0 : i32
    %c0_i32_1 = arith.constant 0 : i32
    return %arg0, %c0_i32, %c0_i32_0 : i32, i32, i32
  }
}

</mosaic_0001>

<bundles_post_ra>
// kernel: tpu_custom_call.1
= control target key start
LH: loop header
LB: loop body
LE: loop exit
PB: predicated region body
PF: predicated region fallthrough
CT: control target
= control target key end

     0   :  { %s2557_s0 = inlined_call_operand.vmem [shape: s8[2,128,128], index: 0, kind: input, shape index: {}]   ;;  %s2558_s1 = inlined_call_operand.vmem [shape: f32[128,32], index: 1, kind: input, shape index: {}]   ;;  %s2559_s2 = inlined_call_operand.vmem [shape: f32[2,128,1], index: 2, kind: input, shape index: {}]   ;;  %s2560_s3 = inlined_call_operand.vmem [shape: bf16[2,32,128], index: 3, kind: input, shape index: {}]   ;;  %s2561_s4 = inlined_call_operand.vmem [shape: bf16[2,2,32,128], index: 4, kind: input, shape index: {}]   ;;  %s2562_s5 = inlined_call_operand.vmem [shape: f32[2,1,128], index: 5, kind: input, shape index: {}]   ;;  %s2563_s6 = inlined_call_operand.hbm [shape: f32[2,128,128], index: 6, kind: output, shape index: {}]  }
   0x1   :  { %2573 = sst [smem:[#allocation16_spill]] %s2557_s0 }
   0x2   :  { %11 = vsyncpa [#allocation5], 0 }
   0x3   :  { %13 = vsyncpa [#allocation5 + $0x1], 0  ;;  %s1873_s21 = smov 0   ;;  %s1875_s22 = smov 0  }
   0x4   :  { %s1877_s23 = smov 0   ;;  %s1879_s24 = smov 0  }
   0x5   :  { %s1881_s25 = smov 0   ;;  %s1883_s26 = smov 0  }
   0x6   :  { %s1885_s27 = smov 0   ;;  %s1887_s28 = smov 0  }
   0x7 LB: > { %2574 = sst [smem:[#allocation7_spill]] %s1803_s21  ;;  %s1522_s29 = sadd.s32 4294967295, %s1831_s28   ;;  %s1831_s28 = sphi %s1887_s28, %s19_s28   ;;  %s1827_s27 = sphi %s1885_s27, %s2595_s27   ;;  %s1823_s26 = sphi %s1883_s26, %s2594_s26   ;;  %s1819_s25 = sphi %s1881_s25, %s2593_s25   ;;  %s1815_s24 = sphi %s1879_s24, %s2598_s24   ;;  %s1811_s23 = sphi %s1877_s23, %s2591_s23   ;;  %s1807_s22 = sphi %s1875_s22, %s2597_s22   ;;  %s1803_s21 = sphi %s1873_s21, %s2596_s21  }
   0x8   : > { %2575 = sst [smem:[#allocation8_spill]] %s1811_s23  ;;  %s1523_s30 = sadd.s32 4294967294, %s1831_s28  }
   0x9   : > { %2576 = sst [smem:[#allocation9_spill]] %s1823_s26  ;;  %s41_s7 = sadd.s32 1, %s1823_s26 }
   0xa   : > { %2577 = sst [smem:[#allocation10_spill]] %s1827_s27  ;;  %p43_p0 = scmp.ge.s32.totalorder %s41_s7, 2 }
   0xb   : > { %2578 = sst [smem:[#allocation11_spill]] %s1831_s28  ;;  %s45_s8 = sadd.s32 1, %s1827_s27 }
   0xc   : > { %p215_p1 = scmp.ne.s32.totalorder %s1811_s23, %s1807_s22  ;;  %p216_p2 = scmp.eq.s32.totalorder %s1522_s29, 3 }
   0xd   : > { %s2600_s7 = smov (%p43_p0, %s41_s7), 0  ;;  %s2602_s8 = smov (!%p43_p0, %s45_s8), %s1827_s27 }
   0xe   : > { %2579 = sst [smem:[#allocation12_spill]] %s2600_s7  ;;  %p1922_p3 = por %p216_p2, %p215_p1 }
   0xf   : > { %p221_p4 = scmp.ne.s32.totalorder %s1807_s22, %s1803_s21  ;;  %p47_p5 = scmp.ge.s32.totalorder %s2602_s8, 2 }
  0x10   : > { %p222_p6 = scmp.eq.s32.totalorder %s1523_s30, 3  ;;  %p1526_p7 = scmp.ge.s32.totalorder %s1831_s28, 1 }
  0x11   : > { %p285_p8 = scmp.lt.s32.totalorder %s1831_s28, 5  ;;  %s2604_s8 = smov (%p47_p5, %s2602_s8), 0 }
  0x12   : > { %2581 = sst [smem:[#allocation13_spill]] %s2604_s8  ;;  %p1932_p9 = por %p222_p6, %p221_p4 }
  0x13   : > { %p286_p10 = pnand %p1526_p7, %p285_p8  ;;  %s202_s11 = ssub.s32 %s1827_s27, %s2604_s8 }
  0x14   : > { %s2582_s10 = scalar_select %p1932_p9, 1, 0 }
  0x15   : > { %s205_s12 = sadd.s32 1, %s1811_s23  ;;  %p203_p11 = scmp.eq.s32.totalorder %s202_s11, 0 }
  0x16   : > { %2583 = sst [smem:[#allocation14_spill]] %s2582_s10  ;;  %289 = sbr.rel (%p286_p10) target bundleno = 854 (0x356), region = 44 }
  0x17   : > { %s1940_s13 = scalar_select %p203_p11, %s1811_s23, %s205_s12  }
  0x18   : > { %s2564_s14 = sand.u32 (!%p286_p10), 1, %s1807_s22   ;;  %p337_p12 = scmp.lt.s32.totalorder (!%p286_p10), %s1819_s25, 1 }
  0x19   : > { %2584 = sst [smem:[#allocation15_spill]] %s1940_s13  ;;  %s1527_s15 = sshll.u32 (!%p286_p10), %s2564_s14, 7 }
  0x1a   : > { %p354_p13 = scmp.lt.s32.totalorder (!%p286_p10), %s1815_s24, 1  ;;  %p366_p0 = scmp.eq.s32.totalorder (!%p286_p10), %s1815_s24, 0 }
  0x1b   : > { %s1949_s16 = scalar_select %p337_p12, %s1819_s25, 1  ;;  %v1833_v3 = vmov (%p366_p0), 0   ;;  %v378_v17 = vld [vmem:[%s2558_s1 + $0x20] sm:$0xff] (%p366_p0)  ;;  %vm523_vm0 = vcmask (%p366_p0), 257024   ;;  %v379_v21 = vld [vmem:[%s2558_s1 + $0x28] sm:$0xff] (%p366_p0)  ;;  %v385_v29 = vld [vmem:[%s2558_s1 + $0x58] sm:$0xff] (%p366_p0) }
  0x1c   : > { %s355_s17 = scalar_select %p354_p13, %s1815_s24, 1  ;;  %1732 = vset.pattern.permute.xlu2 (%p366_p0), %v1833_v3  ;;  %1731 = vset.pattern.permute.xlu1 (%p366_p0), %v1833_v3  ;;  %v382_v25 = vld [vmem:[%s2558_s1 + $0x40] sm:$0xff] (%p366_p0)  ;;  %v376_v30 = vld [vmem:[%s2558_s1 + $0x10] sm:$0xff] (%p366_p0)  ;;  %v377_v42 = vld [vmem:[%s2558_s1 + $0x18] sm:$0xff] (%p366_p0) }
  0x1d   : > { %s1621_s18 = sshll.u32 %s1949_s16, 5  ;;  %s1622_s19 = sshll.u32 %s1949_s16, 7  ;;  %1730 = vset.pattern.permute.xlu0 (%p366_p0), %v1833_v3  ;;  %v374_v31 = vld [vmem:[%s2558_s1] sm:$0xff] (%p366_p0)  ;;  %v388_v41 = vld [vmem:[%s2558_s1 + $0x70] sm:$0xff] (%p366_p0)  ;;  %v375_v43 = vld [vmem:[%s2558_s1 + $0x8] sm:$0xff] (%p366_p0) }
  0x1e   : > { %s2585_s0 = sld [smem:[#allocation16_spill]]  ;;  %s1962_s14 = scalar_lea.vmem %s2559_s2, %s1622_s19  ;;  %v381_v53 = vld [vmem:[%s2558_s1 + $0x38] sm:$0xff] (%p366_p0)  ;;  %v380_v54 = vld [vmem:[%s2558_s1 + $0x30] sm:$0xff] (%p366_p0)  ;;  %v383_v62 = vld [vmem:[%s2558_s1 + $0x48] sm:$0xff] (%p366_p0) }
  0x1f   : > { %s1623_s8 = sshll.u32 %s1949_s16, 4  ;;  %s1534_s7 = sshll.u32 %s355_s17, 2  ;;  %v395_v0 = vld [vmem:[%s1962_s14 + $0x20] sm:$0xff] (%p366_p0)  ;;  %v393_v1 = vld [vmem:[%s1962_s14 + $0x10] sm:$0xff] (%p366_p0)  ;;  %v396_v4 = vld [vmem:[%s1962_s14 + $0x28] sm:$0xff] (%p366_p0) }
  0x20   : > { %s1968_s13 = scalar_lea.vmem %s2560_s3, %s1623_s8  ;;  %s1535_s23 = sshll.u32 %s1949_s16, 3  ;;  %v391_v2 = vld [vmem:[%s1962_s14] sm:$0xff] (%p366_p0)  ;;  %429 = vperm.xlu2 (%p366_p0), %1732, %v395_v0   ;;  %419 = vperm.xlu1 (%p366_p0), %1731, %v393_v1   ;;  %v394_v5 = vld [vmem:[%s1962_s14 + $0x18] sm:$0xff] (%p366_p0)  ;;  %v392_v6 = vld [vmem:[%s1962_s14 + $0x8] sm:$0xff] (%p366_p0) }
  0x21   : > { %s358_s10 = sadd.s32 %s1535_s23, %s1534_s7  ;;  %s363_s20 = scalar_lea.vmem %s2562_s5, %s1949_s16  ;;  %409 = vperm.xlu0 (%p366_p0), %1730, %v391_v2   ;;  %v399_v7 = vld [vmem:[%s1962_s14 + $0x40] sm:$0xff] (%p366_p0)  ;;  %v398_v8 = vld [vmem:[%s1962_s14 + $0x38] sm:$0xff] (%p366_p0)  ;;  %v397_v9 = vld [vmem:[%s1962_s14 + $0x30] sm:$0xff] (%p366_p0) }
  0x22   : > { %s1980_s19 = scalar_lea.vmem [#allocation4], %s1527_s15  ;;  %371 = sbr.rel (!%p366_p0) target bundleno = 193 (0xc1), region = 48  ;;  %v402_v10 = vld [vmem:[%s1962_s14 + $0x58] sm:$0xff] (%p366_p0)  ;;  %v401_v11 = vld [vmem:[%s1962_s14 + $0x50] sm:$0xff] (%p366_p0)  ;;  %v400_v12 = vld [vmem:[%s1962_s14 + $0x48] sm:$0xff] (%p366_p0) }
  0x23   : > { %v405_v13 = vld [vmem:[%s1962_s14 + $0x70] sm:$0xff] (%p366_p0)  ;;  %v404_v14 = vld [vmem:[%s1962_s14 + $0x68] sm:$0xff] (%p366_p0)  ;;  %v403_v15 = vld [vmem:[%s1962_s14 + $0x60] sm:$0xff] (%p366_p0) }
  0x24   : > { %s1957_s30 = scalar_lea.vmem %s2585_s0, %s1621_s18  ;;  %s1536_s18 = sshll.u32 %s358_s10, 2  ;;  %v406_v16 = vld [vmem:[%s1962_s14 + $0x78] sm:$0xff] (%p366_p0)  ;;  %v384_v61 = vld [vmem:[%s2558_s1 + $0x50] sm:$0xff] (%p366_p0) }
  0x25   : > { %s1978_s11 = scalar_lea.vmem %s2561_s4, %s1536_s18 }
  0x28   : > { %434 = vperm.xlu2 %1732, %v396_v4   ;;  %424 = vperm.xlu1 %1731, %v394_v5   ;;  %v387_v5 = vld [vmem:[%s2558_s1 + $0x68] sm:$0xff] }
  0x29   : > { %414 = vperm.xlu0 %1730, %v392_v6   ;;  %v386_v6 = vld [vmem:[%s2558_s1 + $0x60] sm:$0xff] }
  0x30   : > { %449 = vperm.xlu2 %1732, %v399_v7   ;;  %444 = vperm.xlu1 %1731, %v398_v8  }
  0x31   : > { %439 = vperm.xlu0 %1730, %v397_v9  }
  0x38   : > { %464 = vperm.xlu2 %1732, %v402_v10   ;;  %459 = vperm.xlu1 %1731, %v401_v11  }
  0x39   : > { %454 = vperm.xlu0 %1730, %v400_v12  }
  0x40   : > { %479 = vperm.xlu2 %1732, %v405_v13   ;;  %474 = vperm.xlu1 %1731, %v404_v14   ;;  %v389_v13 = vld [vmem:[%s2558_s1 + $0x78] sm:$0xff] }
  0x41   : > { %469 = vperm.xlu0 %1730, %v403_v15  }
  0x49   : > { %484 = vperm.xlu0 %1730, %v406_v16  }
  0x7a   : > { %v430_v18 = vpop.permute.xlu2 %429 }
  0x7b   : > { %v491_v19 = vmul.f32 %v430_v18, %v378_v17 }
  0x7d   : > { %v507_v20 = vpack.c.bf16 %v491_v19, %v491_v19 }
  0x7f   : > { %528 = vst.msk [vmem:[#allocation2 + $0x10] sm:$0xf] %vm523_vm0, %v507_v20 }
  0x82   : > { %v435_v22 = vpop.permute.xlu2 %434 }
  0x83   : > { %v492_v23 = vmul.f32 %v435_v22, %v379_v21 }
  0x85   : > { %v508_v24 = vpack.c.bf16 %v492_v23, %v492_v23 }
  0x87   : > { %529 = vst.msk [vmem:[#allocation2 + $0x14] sm:$0xf] %vm523_vm0, %v508_v24 }
  0x8a   : > { %v450_v26 = vpop.permute.xlu2 %449 }
  0x8b   : > { %v495_v27 = vmul.f32 %v450_v26, %v382_v25 }
  0x8d   : > { %v511_v28 = vpack.c.bf16 %v495_v27, %v495_v27 }
  0x8f   : > { %532 = vst.msk [vmem:[#allocation2 + $0x20] sm:$0xf] %vm523_vm0, %v511_v28 }
  0x92   : > { %v465_v32 = vpop.permute.xlu2 %464  ;;  %v420_v34 = vpop.permute.xlu1 %419 }
  0x93   : > { %v498_v33 = vmul.f32 %v465_v32, %v385_v29  ;;  %v410_v35 = vpop.permute.xlu0 %409  ;;  %v489_v36 = vmul.f32 %v420_v34, %v376_v30 }
  0x94   : > { %v487_v37 = vmul.f32 %v410_v35, %v374_v31 }
  0x95   : > { %v514_v38 = vpack.c.bf16 %v498_v33, %v498_v33  ;;  %v505_v39 = vpack.c.bf16 %v489_v36, %v489_v36 }
  0x96   : > { %v503_v40 = vpack.c.bf16 %v487_v37, %v487_v37 }
  0x97   : > { %535 = vst.msk [vmem:[#allocation2 + $0x2c] sm:$0xf] %vm523_vm0, %v514_v38 }
  0x98   : > { %526 = vst.msk [vmem:[#allocation2 + $0x8] sm:$0xf] %vm523_vm0, %v505_v39 }
  0x99   : > { %524 = vst.msk [vmem:[#allocation2] sm:$0xf] %vm523_vm0, %v503_v40 }
  0x9a   : > { %v480_v44 = vpop.permute.xlu2 %479  ;;  %v425_v46 = vpop.permute.xlu1 %424 }
  0x9b   : > { %v501_v45 = vmul.f32 %v480_v44, %v388_v41  ;;  %v415_v47 = vpop.permute.xlu0 %414  ;;  %v490_v48 = vmul.f32 %v425_v46, %v377_v42 }
  0x9c   : > { %v488_v49 = vmul.f32 %v415_v47, %v375_v43 }
  0x9d   : > { %v517_v50 = vpack.c.bf16 %v501_v45, %v501_v45  ;;  %v506_v51 = vpack.c.bf16 %v490_v48, %v490_v48 }
  0x9e   : > { %v504_v52 = vpack.c.bf16 %v488_v49, %v488_v49 }
  0x9f   : > { %538 = vst.msk [vmem:[#allocation2 + $0x38] sm:$0xf] %vm523_vm0, %v517_v50 }
  0xa0   : > { %527 = vst.msk [vmem:[#allocation2 + $0xc] sm:$0xf] %vm523_vm0, %v506_v51 }
  0xa1   : > { %525 = vst.msk [vmem:[#allocation2 + $0x4] sm:$0xf] %vm523_vm0, %v504_v52 }
  0xa2   : > { %v445_v55 = vpop.permute.xlu1 %444 }
  0xa3   : > { %v440_v56 = vpop.permute.xlu0 %439  ;;  %v494_v57 = vmul.f32 %v445_v55, %v381_v53 }
  0xa4   : > { %v493_v58 = vmul.f32 %v440_v56, %v380_v54 }
  0xa5   : > { %v510_v59 = vpack.c.bf16 %v494_v57, %v494_v57 }
  0xa6   : > { %v509_v60 = vpack.c.bf16 %v493_v58, %v493_v58 }
  0xa7   : > { %531 = vst.msk [vmem:[#allocation2 + $0x1c] sm:$0xf] %vm523_vm0, %v510_v59 }
  0xa8   : > { %530 = vst.msk [vmem:[#allocation2 + $0x18] sm:$0xf] %vm523_vm0, %v509_v60 }
  0xaa   : > { %v460_v63 = vpop.permute.xlu1 %459 }
  0xab   : > { %v455_v0 = vpop.permute.xlu0 %454  ;;  %v497_v1 = vmul.f32 %v460_v63, %v384_v61 }
  0xac   : > { %v496_v2 = vmul.f32 %v455_v0, %v383_v62 }
  0xad   : > { %v513_v3 = vpack.c.bf16 %v497_v1, %v497_v1 }
  0xae   : > { %v512_v4 = vpack.c.bf16 %v496_v2, %v496_v2 }
  0xaf   : > { %534 = vst.msk [vmem:[#allocation2 + $0x28] sm:$0xf] %vm523_vm0, %v513_v3 }
  0xb0   : > { %533 = vst.msk [vmem:[#allocation2 + $0x24] sm:$0xf] %vm523_vm0, %v512_v4 }
  0xb2   : > { %v475_v7 = vpop.permute.xlu1 %474 }
  0xb3   : > { %v470_v8 = vpop.permute.xlu0 %469  ;;  %v500_v9 = vmul.f32 %v475_v7, %v387_v5 }
  0xb4   : > { %v499_v10 = vmul.f32 %v470_v8, %v386_v6 }
  0xb5   : > { %v516_v11 = vpack.c.bf16 %v500_v9, %v500_v9 }
  0xb6   : > { %v515_v12 = vpack.c.bf16 %v499_v10, %v499_v10 }
  0xb7   : > { %537 = vst.msk [vmem:[#allocation2 + $0x34] sm:$0xf] %vm523_vm0, %v516_v11 }
  0xb8   : > { %536 = vst.msk [vmem:[#allocation2 + $0x30] sm:$0xf] %vm523_vm0, %v515_v12 }
  0xbb   : > { %v485_v14 = vpop.permute.xlu0 %484 }
  0xbc   : > { %v502_v15 = vmul.f32 %v485_v14, %v389_v13 }
  0xbe   : > { %v518_v16 = vpack.c.bf16 %v502_v15, %v502_v15 }
  0xc0   : > { %539 = vst.msk [vmem:[#allocation2 + $0x3c] sm:$0xf] %vm523_vm0, %v518_v16 }
  0xc1 PF: > { %p609_p1 = scmp.lt.s32.totalorder %s1815_s24, 0  ;;  %s610_s27 = ssub.s32 0, %s1815_s24  ;;  %v794_v17 = vld [vmem:[%s1962_s14] sm:$0xff]  ;;  %v1834_v18 = vmov 0   ;;  %v795_v19 = vld [vmem:[%s1962_s14 + $0x8] sm:$0xff]  ;;  %v796_v23 = vld [vmem:[%s1962_s14 + $0x10] sm:$0xff] }
  0xc2   : > { %s1538_s28 = smin.u32 %s1815_s24, %s610_s27  ;;  %1733 = vset.pattern.permute.xlu0 %v1834_v18  ;;  %1734 = vset.pattern.permute.xlu1 %v1834_v18  ;;  %v798_v21 = vld [vmem:[%s1962_s14 + $0x20] sm:$0xff]  ;;  %v797_v25 = vld [vmem:[%s1962_s14 + $0x18] sm:$0xff]  ;;  %v807_v26 = vld [vmem:[%s1962_s14 + $0x68] sm:$0xff]  ;;  %vm544_vm1 = vcmask 261120   ;;  %p1591_p4 = scmp.ne.s32.totalorder %s1815_s24, 0 }
  0xc3   : > { %s612_s7 = sand.u32 1, %s1538_s28   ;;  %828 = vperm.xlu0 %1733, %v794_v17   ;;  %1735 = vset.pattern.permute.xlu2 %v1834_v18  ;;  %v808_v29 = vld [vmem:[%s1962_s14 + $0x70] sm:$0xff]  ;;  %v799_v30 = vld [vmem:[%s1962_s14 + $0x28] sm:$0xff]  ;;  %v565_v33 = vld [vmem:[%s1957_s30] sm:$0xff] }
  0xc4   : > { %s613_s8 = ssub.s32 0, %s612_s7  ;;  %838 = vperm.xlu1 %1734, %v796_v23   ;;  %v804_v31 = vld [vmem:[%s1962_s14 + $0x50] sm:$0xff]  ;;  %v569_v35 = vunpack.c.0.s8 %v565_v33  ;;  %v570_v36 = vunpack.c.1.s8 %v565_v33  ;;  %v805_v41 = vld [vmem:[%s1962_s14 + $0x58] sm:$0xff]  ;;  %v803_v46 = vld [vmem:[%s1962_s14 + $0x48] sm:$0xff]  ;;  %v571_v52 = vunpack.c.2.s8 %v565_v33  ;;  %v572_v53 = vunpack.c.3.s8 %v565_v33 }
  0xc5   : > { %s2606_s8 = smov (!%p609_p1, %s613_s8), %s612_s7  ;;  %v567_v34 = vld [vmem:[%s1957_s30 + $0x10] sm:$0xff]  ;;  %878 = vperm.xlu2 %1735, %v804_v31   ;;  %v809_v50 = vld [vmem:[%s1962_s14 + $0x78] sm:$0xff]  ;;  %v806_v51 = vld [vmem:[%s1962_s14 + $0x60] sm:$0xff] }
  0xc6   : > { %p1540_p2 = scmp.lt.s32.totalorder %s2606_s8, 0  ;;  %s619_s10 = sadd.s32 2, %s2606_s8  ;;  %v577_v37 = vunpack.c.0.s8 %v567_v34  ;;  %v578_v38 = vunpack.c.1.s8 %v567_v34  ;;  %v800_v40 = vld [vmem:[%s1962_s14 + $0x30] sm:$0xff]  ;;  %v585_v42 = vcvt.s32.f32 %v569_v35  ;;  %v586_v43 = vcvt.s32.f32 %v570_v36  ;;  %v801_v56 = vld [vmem:[%s1962_s14 + $0x38] sm:$0xff]  ;;  %v802_v63 = vld [vmem:[%s1962_s14 + $0x40] sm:$0xff] }
  0xc7   : > { %v579_v54 = vunpack.c.2.s8 %v567_v34  ;;  %v580_v55 = vunpack.c.3.s8 %v567_v34  ;;  %v587_v57 = vcvt.s32.f32 %v571_v52  ;;  %v588_v58 = vcvt.s32.f32 %v572_v53  ;;  %v566_v0 = vld [vmem:[%s1957_s30 + $0x8] sm:$0xff]  ;;  %v568_v1 = vld [vmem:[%s1957_s30 + $0x18] sm:$0xff] }
  0xc8   : > { %s2608_s10 = smov (!%p1540_p2, %s619_s10), %s2606_s8  ;;  %v593_v44 = vcvt.s32.f32 %v577_v37  ;;  %v594_v45 = vcvt.s32.f32 %v578_v38  ;;  %v601_v48 = vpack.c.bf16 %v586_v43, %v585_v42  ;;  %v573_v2 = vunpack.c.0.s8 %v566_v0  ;;  %v1634_v23 = vld [vmem:[%s1978_s11 + $0x8] sm:$0xff] }
  0xc9   : > { %s1541_s15 = sshll.u32 %s2608_s10, 7  ;;  %v595_v59 = vcvt.s32.f32 %v579_v54  ;;  %v596_v60 = vcvt.s32.f32 %v580_v55  ;;  %v602_v61 = vpack.c.bf16 %v588_v58, %v587_v57  ;;  %v574_v3 = vunpack.c.1.s8 %v566_v0  ;;  %976 = vmatpush.bf16.msra.mxu1 %v1634_v23  ;;  %1646 = vmatpush.bf16.msra.mxu3 %v1634_v23 }
  0xca   : > { %s624_s17 = sshra.s32 %s1541_s15, 3  ;;  %v605_v49 = vpack.c.bf16 %v594_v45, %v593_v44  ;;  %v581_v4 = vunpack.c.0.s8 %v568_v1  ;;  %v582_v5 = vunpack.c.1.s8 %v568_v1  ;;  %v589_v6 = vcvt.s32.f32 %v573_v2 }
  0xcb   : > { %833 = vperm.xlu0 %1733, %v795_v19   ;;  %s1542_s12 = sshll.u32 %s624_s17, 2  ;;  %v606_v62 = vpack.c.bf16 %v596_v60, %v595_v59  ;;  %v590_v7 = vcvt.s32.f32 %v574_v3  ;;  %v575_v12 = vunpack.c.2.s8 %v566_v0  ;;  %v576_v13 = vunpack.c.3.s8 %v566_v0 }
  0xcc   : > { %s2069_s18 = scalar_lea.vmem [#allocation2], %s1542_s12  ;;  %843 = vperm.xlu1 %1734, %v797_v25   ;;  %v597_v8 = vcvt.s32.f32 %v581_v4  ;;  %v598_v9 = vcvt.s32.f32 %v582_v5  ;;  %v583_v14 = vunpack.c.2.s8 %v568_v1  ;;  %v584_v15 = vunpack.c.3.s8 %v568_v1 }
  0xcd   : > { %v1632_v20 = vld [vmem:[%s2069_s18 + $0x38] sm:$0xff]  ;;  %v1631_v22 = vld [vmem:[%s2069_s18 + $0x30] sm:$0xff]  ;;  %v1630_v24 = vld [vmem:[%s2069_s18 + $0x28] sm:$0xff]  ;;  %883 = vperm.xlu2 %1735, %v805_v41   ;;  %v603_v10 = vpack.c.bf16 %v590_v7, %v589_v6  ;;  %v591_v16 = vcvt.s32.f32 %v575_v12  ;;  %v592_v17 = vcvt.s32.f32 %v576_v13 }
  0xce   : > { %708 = vmatpush.bf16.msra.mxu0 %v1632_v20  ;;  %1638 = vmatpush.bf16.msra.mxu2 %v1632_v20  ;;  %v1629_v27 = vld [vmem:[%s2069_s18 + $0x20] sm:$0xff]  ;;  %v1628_v28 = vld [vmem:[%s2069_s18 + $0x18] sm:$0xff]  ;;  %v1627_v32 = vld [vmem:[%s2069_s18 + $0x10] sm:$0xff]  ;;  %v607_v11 = vpack.c.bf16 %v598_v9, %v597_v8  ;;  %v599_v18 = vcvt.s32.f32 %v583_v14  ;;  %v600_v19 = vcvt.s32.f32 %v584_v15 }
  0xcf   : > { %v1626_v39 = vld [vmem:[%s2069_s18 + $0x8] sm:$0xff]  ;;  %v1625_v47 = vld [vmem:[%s2069_s18] sm:$0xff]  ;;  %v604_v20 = vpack.c.bf16 %v592_v17, %v591_v16 }
  0xd2   : > { %709 = vmatpush.bf16.msra.mxu0 %v1631_v22  ;;  %1639 = vmatpush.bf16.msra.mxu2 %v1631_v22  ;;  %v1835_v22 = vmov 0.0  }
  0xd3   : > { %848 = vperm.xlu0 %1733, %v798_v21   ;;  %v608_v21 = vpack.c.bf16 %v600_v19, %v599_v18  ;;  %545 = vst.msk [vmem:[#allocation3] sm:$0xff] %vm544_vm1, %v1835_v22 }
  0xd4   : > { %853 = vperm.xlu1 %1734, %v799_v30   ;;  %546 = vst.msk [vmem:[#allocation3 + $0x8] sm:$0xff] %vm544_vm1, %v1835_v22 }
  0xd5   : > { %888 = vperm.xlu2 %1735, %v806_v51   ;;  %547 = vst.msk [vmem:[#allocation3 + $0x10] sm:$0xff] %vm544_vm1, %v1835_v22 }
  0xd6   : > { %710 = vmatpush.bf16.msra.mxu0 %v1630_v24  ;;  %1640 = vmatpush.bf16.msra.mxu2 %v1630_v24  ;;  %548 = vst.msk [vmem:[#allocation3 + $0x18] sm:$0xff] %vm544_vm1, %v1835_v22  ;;  %v1633_v24 = vld [vmem:[%s1978_s11] sm:$0xff] }
  0xd7   : > { %549 = vst.msk [vmem:[#allocation3 + $0x20] sm:$0xff] %vm544_vm1, %v1835_v22  ;;  %977 = vmatpush.bf16.msra.mxu1 %v1633_v24  ;;  %1647 = vmatpush.bf16.msra.mxu3 %v1633_v24 }
  0xd8   : > { %550 = vst.msk [vmem:[#allocation3 + $0x28] sm:$0xff] %vm544_vm1, %v1835_v22 }
  0xd9   : > { %551 = vst.msk [vmem:[#allocation3 + $0x30] sm:$0xff] %vm544_vm1, %v1835_v22 }
  0xda   : > { %711 = vmatpush.bf16.msra.mxu0 %v1629_v27  ;;  %1641 = vmatpush.bf16.msra.mxu2 %v1629_v27  ;;  %552 = vst.msk [vmem:[#allocation3 + $0x38] sm:$0xff] %vm544_vm1, %v1835_v22  ;;  %v644_v25 = vld [vmem:[#allocation3] sm:$0xff] }
  0xdb   : > { %893 = vperm.xlu0 %1733, %v807_v26   ;;  %553 = vst.msk [vmem:[#allocation3 + $0x40] sm:$0xff] %vm544_vm1, %v1835_v22  ;;  %v645_v30 = vld [vmem:[#allocation3 + $0x8] sm:$0xff] }
  0xdc   : > { %858 = vperm.xlu1 %1734, %v800_v40   ;;  %554 = vst.msk [vmem:[#allocation3 + $0x48] sm:$0xff] %vm544_vm1, %v1835_v22  ;;  %v646_v37 = vld [vmem:[#allocation3 + $0x10] sm:$0xff] }
  0xdd   : > { %863 = vperm.xlu2 %1735, %v801_v56   ;;  %555 = vst.msk [vmem:[#allocation3 + $0x50] sm:$0xff] %vm544_vm1, %v1835_v22 }
  0xde   : > { %712 = vmatpush.bf16.msra.mxu0 %v1628_v28  ;;  %1642 = vmatpush.bf16.msra.mxu2 %v1628_v28  ;;  %556 = vst.msk [vmem:[#allocation3 + $0x58] sm:$0xff] %vm544_vm1, %v1835_v22  ;;  %v648_v57 = vld [vmem:[#allocation3 + $0x20] sm:$0xff] }
  0xdf   : > { %557 = vst.msk [vmem:[#allocation3 + $0x60] sm:$0xff] %vm544_vm1, %v1835_v22  ;;  %v649_v5 = vld [vmem:[#allocation3 + $0x28] sm:$0xff] }
  0xe0   : > { %558 = vst.msk [vmem:[#allocation3 + $0x68] sm:$0xff] %vm544_vm1, %v1835_v22  ;;  %v650_v18 = vld [vmem:[#allocation3 + $0x30] sm:$0xff] }
  0xe1   : > { %559 = vst.msk [vmem:[#allocation3 + $0x70] sm:$0xff] %vm544_vm1, %v1835_v22 }
  0xe2   : > { %713 = vmatpush.bf16.msra.mxu0 %v1627_v32  ;;  %1643 = vmatpush.bf16.msra.mxu2 %v1627_v32  ;;  %560 = vst.msk [vmem:[#allocation3 + $0x78] sm:$0xff] %vm544_vm1, %v1835_v22  ;;  %v652_v28 = vld [vmem:[#allocation3 + $0x40] sm:$0xff] }
  0xe3   : > { %898 = vperm.xlu0 %1733, %v808_v29   ;;  %v653_v35 = vld [vmem:[#allocation3 + $0x48] sm:$0xff] }
  0xe4   : > { %903 = vperm.xlu1 %1734, %v809_v50  }
  0xe5   : > { %868 = vperm.xlu2 %1735, %v802_v63   ;;  %v655_v54 = vld [vmem:[#allocation3 + $0x58] sm:$0xff] }
  0xe6   : > { %714 = vmatpush.bf16.msra.mxu0 %v1626_v39  ;;  %1644 = vmatpush.bf16.msra.mxu2 %v1626_v39  ;;  %v656_v2 = vld [vmem:[#allocation3 + $0x60] sm:$0xff] }
  0xe7   : > { %v657_v15 = vld [vmem:[#allocation3 + $0x68] sm:$0xff] }
  0xea   : > { %715 = vmatpush.bf16.msra.mxu0 %v1625_v47  ;;  %1645 = vmatpush.bf16.msra.mxu2 %v1625_v47 }
  0xeb   : > { %873 = vperm.xlu0 %1733, %v803_v46   ;;  %v654_v46 = vld [vmem:[#allocation3 + $0x50] sm:$0xff] }
  0xed   : > { %716 = vmatmul.bf16.vlgmr.msra.gmra.mxu0 %v601_v48  ;;  %736 = vmatmul.bf16.vlgmr.msra.gmra.mxu2 %v605_v49  ;;  %v647_v49 = vld [vmem:[#allocation3 + $0x18] sm:$0xff] }
  0xfd   : > { %721 = vmatmul.bf16.gmra.mxu0 %v602_v61  ;;  %741 = vmatmul.bf16.gmra.mxu2 %v606_v62 }
 0x10d   : > { %726 = vmatmul.bf16.gmra.mxu0 %v603_v10  ;;  %746 = vmatmul.bf16.gmra.mxu2 %v607_v11 }
 0x11d   : > { %731 = vmatmul.bf16.gmra.mxu0 %v604_v20  ;;  %751 = vmatmul.bf16.gmra.mxu2 %v608_v21 }
 0x11f   : > { %v2137_v55 = vpop.permute.xlu2 %878 }
 0x127   : > { %v2152_v8 = vpop.permute.xlu2 %883 }
 0x135   : > { %v2116_v32 = vpop.permute.xlu0 %828 }
 0x136   : > { %v2133_v51 = vpop.permute.xlu1 %838 }
 0x13d   : > { %v2121_v42 = vpop.permute.xlu0 %833 }
 0x13e   : > { %v2140_v62 = vpop.permute.xlu1 %843 }
 0x145   : > { %v2164_v16 = vpop.permute.xlu0 %848 }
 0x146   : > { %v2168_v23 = vpop.permute.xlu1 %853 }
 0x16a   : > { %v717_v26 = vpop.f32.mrf.mxu0 }
 0x16b   : > { %v757_v27 = vadd.f32 %v717_v26, %v644_v25 }
 0x16d   : > { %774 = vst.msk [vmem:[#allocation3] sm:$0xff] %vm544_vm1, %v757_v27  ;;  %v658_v27 = vld [vmem:[#allocation3 + $0x70] sm:$0xff] }
 0x170   : > { %v737_v29 = vpop.f32.mrf.mxu2 }
 0x171   : > { %v765_v31 = vadd.f32 %v737_v29, %v652_v28 }
 0x172   : > { %v719_v33 = vpop.f32.mrf.mxu0 }
 0x173   : > { %782 = vst.msk [vmem:[#allocation3 + $0x40] sm:$0xff] %vm544_vm1, %v765_v31  ;;  %v758_v34 = vadd.f32 %v719_v33, %v645_v30  ;;  %v651_v30 = vld [vmem:[#allocation3 + $0x38] sm:$0xff]  ;;  %v2179_v33 = vpop.permute.xlu0 %893 }
 0x174   : > { %v810_v40 = vld [vmem:[#allocation3] sm:$0xff] }
 0x175   : > { %775 = vst.msk [vmem:[#allocation3 + $0x8] sm:$0xff] %vm544_vm1, %v758_v34  ;;  %v2125_v44 = vmul.f32 %v2116_v32, %v810_v40 }
 0x178   : > { %v739_v36 = vpop.f32.mrf.mxu2 }
 0x179   : > { %v766_v38 = vadd.f32 %v739_v36, %v653_v35  ;;  %v2182_v35 = vpop.permute.xlu2 %888 }
 0x17a   : > { %v722_v39 = vpop.f32.mrf.mxu0 }
 0x17b   : > { %783 = vst.msk [vmem:[#allocation3 + $0x48] sm:$0xff] %vm544_vm1, %v766_v38  ;;  %v759_v41 = vadd.f32 %v722_v39, %v646_v37 }
 0x17c   : > { %v811_v43 = vld [vmem:[#allocation3 + $0x8] sm:$0xff] }
 0x17d   : > { %776 = vst.msk [vmem:[#allocation3 + $0x10] sm:$0xff] %vm544_vm1, %v759_v41  ;;  %v2128_v45 = vmul.f32 %v2121_v42, %v811_v43  ;;  %v659_v43 = vld [vmem:[#allocation3 + $0x78] sm:$0xff] }
 0x17f   : > { %v922_v47 = vpack.c.bf16 %v2128_v45, %v2125_v44 }
 0x180   : > { %v742_v48 = vpop.f32.mrf.mxu2 }
 0x181   : > { %v767_v50 = vadd.f32 %v742_v48, %v654_v46  ;;  %1583 = vmatmul.msk.bf16.vlgmr.msra.gmra.mxu1 %vm544_vm1, %v922_v47  ;;  %v2195_v46 = vpop.permute.xlu1 %858 }
 0x182   : > { %v724_v52 = vpop.f32.mrf.mxu0 }
 0x183   : > { %784 = vst.msk [vmem:[#allocation3 + $0x50] sm:$0xff] %vm544_vm1, %v767_v50  ;;  %v760_v53 = vadd.f32 %v724_v52, %v647_v49  ;;  %v2198_v50 = vpop.permute.xlu2 %863 }
 0x184   : > { %v812_v60 = vld [vmem:[#allocation3 + $0x10] sm:$0xff] }
 0x185   : > { %777 = vst.msk [vmem:[#allocation3 + $0x18] sm:$0xff] %vm544_vm1, %v760_v53  ;;  %v2144_v0 = vmul.f32 %v2133_v51, %v812_v60 }
 0x188   : > { %v744_v56 = vpop.f32.mrf.mxu2 }
 0x189   : > { %v768_v58 = vadd.f32 %v744_v56, %v655_v54 }
 0x18a   : > { %v727_v59 = vpop.f32.mrf.mxu0  ;;  %v820_v6 = vld [vmem:[#allocation3 + $0x50] sm:$0xff] }
 0x18b   : > { %785 = vst.msk [vmem:[#allocation3 + $0x58] sm:$0xff] %vm544_vm1, %v768_v58  ;;  %v761_v61 = vadd.f32 %v727_v59, %v648_v57  ;;  %v2156_v12 = vmul.f32 %v2137_v55, %v820_v6  ;;  %v2208_v57 = vpop.permute.xlu0 %898  ;;  %v2211_v59 = vpop.permute.xlu1 %903  ;;  %v818_v6 = vld [vmem:[#allocation3 + $0x40] sm:$0xff] }
 0x18c   : > { %v813_v63 = vld [vmem:[#allocation3 + $0x18] sm:$0xff] }
 0x18d   : > { %778 = vst.msk [vmem:[#allocation3 + $0x20] sm:$0xff] %vm544_vm1, %v761_v61  ;;  %v2147_v1 = vmul.f32 %v2140_v62, %v813_v63 }
 0x18f   : > { %v923_v3 = vpack.c.bf16 %v2147_v1, %v2144_v0 }
 0x190   : > { %v747_v4 = vpop.f32.mrf.mxu2 }
 0x191   : > { %v769_v7 = vadd.f32 %v747_v4, %v656_v2  ;;  %1584 = vmatmul.msk.bf16.gmra.mxu1 %vm544_vm1, %v923_v3  ;;  %v819_v3 = vld [vmem:[#allocation3 + $0x48] sm:$0xff] }
 0x192   : > { %v729_v9 = vpop.f32.mrf.mxu0  ;;  %v821_v10 = vld [vmem:[#allocation3 + $0x58] sm:$0xff] }
 0x193   : > { %786 = vst.msk [vmem:[#allocation3 + $0x60] sm:$0xff] %vm544_vm1, %v769_v7  ;;  %v762_v11 = vadd.f32 %v729_v9, %v649_v5  ;;  %v2159_v13 = vmul.f32 %v2152_v8, %v821_v10  ;;  %v2222_v4 = vpop.permute.xlu0 %873  ;;  %v2224_v5 = vpop.permute.xlu2 %868 }
 0x194   : > { %v814_v21 = vld [vmem:[#allocation3 + $0x20] sm:$0xff]  ;;  %v2227_v7 = vmul.f32 %v2222_v4, %v819_v3  ;;  %v2230_v9 = vmul.f32 %v2224_v5, %v818_v6 }
 0x195   : > { %779 = vst.msk [vmem:[#allocation3 + $0x28] sm:$0xff] %vm544_vm1, %v762_v11  ;;  %v927_v14 = vpack.c.bf16 %v2159_v13, %v2156_v12  ;;  %v2172_v25 = vmul.f32 %v2164_v16, %v814_v21 }
 0x196   : > { %v926_v10 = vpack.c.bf16 %v2227_v7, %v2230_v9 }
 0x197   : > { %1588 = vmatmul.msk.bf16.vlgmr.msra.gmra.mxu3 %vm544_vm1, %v927_v14 }
 0x198   : > { %v749_v17 = vpop.f32.mrf.mxu2 }
 0x199   : > { %v770_v19 = vadd.f32 %v749_v17, %v657_v15 }
 0x19a   : > { %v732_v20 = vpop.f32.mrf.mxu0  ;;  %v822_v31 = vld [vmem:[#allocation3 + $0x60] sm:$0xff] }
 0x19b   : > { %787 = vst.msk [vmem:[#allocation3 + $0x68] sm:$0xff] %vm544_vm1, %v770_v19  ;;  %v763_v22 = vadd.f32 %v732_v20, %v650_v18  ;;  %v2186_v39 = vmul.f32 %v2182_v35, %v822_v31 }
 0x19c   : > { %v815_v24 = vld [vmem:[#allocation3 + $0x28] sm:$0xff] }
 0x19d   : > { %780 = vst.msk [vmem:[#allocation3 + $0x30] sm:$0xff] %vm544_vm1, %v763_v22  ;;  %v2175_v26 = vmul.f32 %v2168_v23, %v815_v24 }
 0x19f   : > { %v924_v28 = vpack.c.bf16 %v2175_v26, %v2172_v25 }
 0x1a0   : > { %v752_v29 = vpop.f32.mrf.mxu2 }
 0x1a1   : > { %v771_v34 = vadd.f32 %v752_v29, %v658_v27  ;;  %1585 = vmatmul.msk.bf16.gmra.mxu1 %vm544_vm1, %v924_v28 }
 0x1a2   : > { %v734_v36 = vpop.f32.mrf.mxu0  ;;  %v823_v37 = vld [vmem:[#allocation3 + $0x68] sm:$0xff] }
 0x1a3   : > { %788 = vst.msk [vmem:[#allocation3 + $0x70] sm:$0xff] %vm544_vm1, %v771_v34  ;;  %v764_v38 = vadd.f32 %v734_v36, %v651_v30  ;;  %v2189_v40 = vmul.f32 %v2179_v33, %v823_v37 }
 0x1a4   : > { %v816_v49 = vld [vmem:[#allocation3 + $0x30] sm:$0xff] }
 0x1a5   : > { %781 = vst.msk [vmem:[#allocation3 + $0x38] sm:$0xff] %vm544_vm1, %v764_v38  ;;  %v928_v41 = vpack.c.bf16 %v2189_v40, %v2186_v39  ;;  %v2201_v53 = vmul.f32 %v2195_v46, %v816_v49 }
 0x1a7   : > { %1589 = vmatmul.msk.bf16.gmra.mxu3 %vm544_vm1, %v928_v41 }
 0x1a8   : > { %v754_v47 = vpop.f32.mrf.mxu2 }
 0x1a9   : > { %v772_v48 = vadd.f32 %v754_v47, %v659_v43 }
 0x1aa   : > { %v824_v58 = vld [vmem:[#allocation3 + $0x70] sm:$0xff] }
 0x1ab   : > { %789 = vst.msk [vmem:[#allocation3 + $0x78] sm:$0xff] %vm544_vm1, %v772_v48  ;;  %v2214_v61 = vmul.f32 %v2208_v57, %v824_v58 }
 0x1ac   : > { %v817_v52 = vld [vmem:[#allocation3 + $0x38] sm:$0xff] }
 0x1ad   : > { %v2204_v54 = vmul.f32 %v2198_v50, %v817_v52 }
 0x1af   : > { %v925_v56 = vpack.c.bf16 %v2204_v54, %v2201_v53 }
 0x1b1   : > { %1586 = vmatmul.msk.bf16.gmra.mxu1 %vm544_vm1, %v925_v56 }
 0x1b2   : > { %v825_v60 = vld [vmem:[#allocation3 + $0x78] sm:$0xff] }
 0x1b3   : > { %v2217_v63 = vmul.f32 %v2211_v59, %v825_v60 }
 0x1b5   : > { %v929_v2 = vpack.c.bf16 %v2217_v63, %v2214_v61 }
 0x1b7   : > { %1590 = vmatmul.msk.bf16.gmra.mxu3 %vm544_vm1, %v929_v2 }
 0x1c1   : > { %1587 = vmatmul.msk.bf16.gmra.mxu1 %vm544_vm1, %v926_v10 }
 0x1fe   : > { %v2235_v11 = vpop.f32.mrf.mxu1 }
 0x206   : > { %v2237_v14 = vpop.f32.mrf.mxu1 }
 0x20e   : > { %v2239_v15 = vpop.f32.mrf.mxu1 }
 0x216   : > { %v2241_v17 = vpop.f32.mrf.mxu1 }
 0x21a   : > { %v2243_v18 = vpop.f32.mrf.mxu3 }
 0x21e   : > { %v2245_v19 = vpop.f32.mrf.mxu1 }
 0x222   : > { %v2247_v20 = vpop.f32.mrf.mxu3 }
 0x226   : > { %v2249_v21 = vpop.f32.mrf.mxu1 }
 0x22a   : > { %v2251_v22 = vpop.f32.mrf.mxu3 }
 0x22e   : > { %v2253_v24 = vpop.f32.mrf.mxu1 }
 0x232   : > { %v2255_v27 = vpop.f32.mrf.mxu3 }
 0x236   : > { %v2257_v28 = vpop.f32.mrf.mxu1 }
 0x23a   : > { %v2259_v29 = vpop.f32.mrf.mxu3 }
 0x23e   : > { %v2261_v30 = vpop.f32.mrf.mxu1 }
 0x242   : > { %v2263_v31 = vpop.f32.mrf.mxu3  ;;  %1021 = sbr.rel (%p1591_p4) target bundleno = 754 (0x2f2), region = 60 }
 0x246   : > { %v2265_v34 = vpop.f32.mrf.mxu1 }
 0x247   : > { %v1636_v36 = vld [vmem:[%s1968_s13 + $0x8] sm:$0xff]  ;;  %v1635_v37 = vld [vmem:[%s1968_s13] sm:$0xff]  ;;  %v1025_v6 = vld [vmem:[%s2558_s1 + $0x10] sm:$0xff] }
 0x248   : > { %v1023_v38 = vld [vmem:[%s2558_s1] sm:$0xff]  ;;  %v1024_v41 = vld [vmem:[%s2558_s1 + $0x8] sm:$0xff]  ;;  %1097 = vmatpush.bf16.msra.mxu0 %v1636_v36  ;;  %1648 = vmatpush.bf16.msra.mxu1 %v1636_v36  ;;  %v1026_v10 = vld [vmem:[%s2558_s1 + $0x18] sm:$0xff] }
 0x249   : > { %v1027_v43 = vld [vmem:[%s2558_s1 + $0x20] sm:$0xff]  ;;  %v1028_v47 = vld [vmem:[%s2558_s1 + $0x28] sm:$0xff]  ;;  %1649 = vmatpush.bf16.msra.mxu2 %v1636_v36  ;;  %1650 = vmatpush.bf16.msra.mxu3 %v1636_v36  ;;  %v1039_v58 = vpack.c.bf16 %v1024_v41, %v1023_v38  ;;  %v1029_v36 = vld [vmem:[%s2558_s1 + $0x30] sm:$0xff] }
 0x24a   : > { %v1031_v48 = vld [vmem:[%s2558_s1 + $0x40] sm:$0xff]  ;;  %v1032_v49 = vld [vmem:[%s2558_s1 + $0x48] sm:$0xff]  ;;  %v1041_v60 = vpack.c.bf16 %v1028_v47, %v1027_v43  ;;  %v1033_v38 = vld [vmem:[%s2558_s1 + $0x50] sm:$0xff] }
 0x24b   : > { %v1035_v52 = vld [vmem:[%s2558_s1 + $0x60] sm:$0xff]  ;;  %v1036_v56 = vld [vmem:[%s2558_s1 + $0x68] sm:$0xff]  ;;  %v1043_v2 = vpack.c.bf16 %v1032_v49, %v1031_v48  ;;  %v1034_v41 = vld [vmem:[%s2558_s1 + $0x58] sm:$0xff]  ;;  %v1040_v48 = vpack.c.bf16 %v1026_v10, %v1025_v6 }
 0x24c   : > { %1098 = vmatpush.bf16.msra.mxu0 %v1635_v37  ;;  %1651 = vmatpush.bf16.msra.mxu1 %v1635_v37  ;;  %v1045_v3 = vpack.c.bf16 %v1036_v56, %v1035_v52  ;;  %v1037_v43 = vld [vmem:[%s2558_s1 + $0x70] sm:$0xff]  ;;  %v1038_v47 = vld [vmem:[%s2558_s1 + $0x78] sm:$0xff]  ;;  %v1044_v52 = vpack.c.bf16 %v1034_v41, %v1033_v38 }
 0x24d   : > { %1652 = vmatpush.bf16.msra.mxu2 %v1635_v37  ;;  %1653 = vmatpush.bf16.msra.mxu3 %v1635_v37  ;;  %v1030_v37 = vld [vmem:[%s2558_s1 + $0x38] sm:$0xff]  ;;  %v1046_v56 = vpack.c.bf16 %v1038_v47, %v1037_v43 }
 0x24e   : > { %v1042_v49 = vpack.c.bf16 %v1030_v37, %v1029_v36 }
 0x24f   : > { %1600 = vmatmul.msk.bf16.vlgmr.msra.gmra.mxu0 %vm544_vm1, %v1039_v58  ;;  %1602 = vmatmul.msk.bf16.vlgmr.msra.gmra.mxu1 %vm544_vm1, %v1041_v60  ;;  %v1736_v58 = vld [vmem:[%s363_s20] ss:$0 sm:$0xff] }
 0x250   : > { %1604 = vmatmul.msk.bf16.vlgmr.msra.gmra.mxu2 %vm544_vm1, %v1043_v2  ;;  %1606 = vmatmul.msk.bf16.vlgmr.msra.gmra.mxu3 %vm544_vm1, %v1045_v3 }
 0x25f   : > { %1601 = vmatmul.msk.bf16.gmra.mxu0 %vm544_vm1, %v1040_v48  ;;  %1603 = vmatmul.msk.bf16.gmra.mxu1 %vm544_vm1, %v1042_v49 }
 0x260   : > { %1605 = vmatmul.msk.bf16.gmra.mxu2 %vm544_vm1, %v1044_v52  ;;  %1607 = vmatmul.msk.bf16.gmra.mxu3 %vm544_vm1, %v1046_v56 }
 0x2cc   : > { %v1100_v60 = vpop.f32.mrf.mxu0  ;;  %v1110_v2 = vpop.f32.mrf.mxu1 }
 0x2cd   : > { %v1101_v3 = vadd.f32 %v1736_v58, %v1100_v60  ;;  %v1111_v6 = vadd.f32 %v1736_v58, %v1110_v2 }
 0x2cf   : > { %v1140_v10 = vadd.f32 %v1101_v3, %v2235_v11  ;;  %v1144_v36 = vadd.f32 %v1111_v6, %v2245_v19 }
 0x2d1   : > { %1157 = vst [vmem:[%s1980_s19] sm:$0xff] %v1140_v10 }
 0x2d2   : > { %1161 = vst [vmem:[%s1980_s19 + $0x20] sm:$0xff] %v1144_v36 }
 0x2d3   : > { %v1120_v37 = vpop.f32.mrf.mxu2  ;;  %v1130_v38 = vpop.f32.mrf.mxu3 }
 0x2d4   : > { %v1121_v41 = vadd.f32 %v1736_v58, %v1120_v37  ;;  %v1131_v43 = vadd.f32 %v1736_v58, %v1130_v38  ;;  %v1102_v47 = vpop.f32.mrf.mxu0  ;;  %v1112_v48 = vpop.f32.mrf.mxu1 }
 0x2d5   : > { %v1103_v49 = vadd.f32 %v1736_v58, %v1102_v47  ;;  %v1113_v52 = vadd.f32 %v1736_v58, %v1112_v48 }
 0x2d6   : > { %v1148_v56 = vadd.f32 %v1121_v41, %v2261_v30  ;;  %v1152_v60 = vadd.f32 %v1131_v43, %v2251_v22 }
 0x2d7   : > { %v1141_v2 = vadd.f32 %v1103_v49, %v2237_v14  ;;  %v1145_v3 = vadd.f32 %v1113_v52, %v2249_v21 }
 0x2d8   : > { %1165 = vst [vmem:[%s1980_s19 + $0x40] sm:$0xff] %v1148_v56 }
 0x2d9   : > { %1169 = vst [vmem:[%s1980_s19 + $0x60] sm:$0xff] %v1152_v60 }
 0x2da   : > { %1158 = vst [vmem:[%s1980_s19 + $0x8] sm:$0xff] %v1141_v2 }
 0x2db   : > { %1162 = vst [vmem:[%s1980_s19 + $0x28] sm:$0xff] %v1145_v3  ;;  %v1122_v6 = vpop.f32.mrf.mxu2  ;;  %v1132_v10 = vpop.f32.mrf.mxu3 }
 0x2dc   : > { %v1123_v36 = vadd.f32 %v1736_v58, %v1122_v6  ;;  %v1133_v37 = vadd.f32 %v1736_v58, %v1132_v10  ;;  %v1105_v38 = vpop.f32.mrf.mxu0  ;;  %v1115_v41 = vpop.f32.mrf.mxu1 }
 0x2dd   : > { %v1106_v47 = vadd.f32 %v1736_v58, %v1105_v38  ;;  %v1116_v43 = vadd.f32 %v1736_v58, %v1115_v41 }
 0x2de   : > { %v1149_v48 = vadd.f32 %v1123_v36, %v2265_v34  ;;  %v1153_v49 = vadd.f32 %v1133_v37, %v2255_v27 }
 0x2df   : > { %v1142_v52 = vadd.f32 %v1106_v47, %v2239_v15  ;;  %v1146_v56 = vadd.f32 %v1116_v43, %v2253_v24 }
 0x2e0   : > { %1166 = vst [vmem:[%s1980_s19 + $0x48] sm:$0xff] %v1149_v48 }
 0x2e1   : > { %1170 = vst [vmem:[%s1980_s19 + $0x68] sm:$0xff] %v1153_v49 }
 0x2e2   : > { %1159 = vst [vmem:[%s1980_s19 + $0x10] sm:$0xff] %v1142_v52 }
 0x2e3   : > { %1163 = vst [vmem:[%s1980_s19 + $0x30] sm:$0xff] %v1146_v56  ;;  %v1125_v60 = vpop.f32.mrf.mxu2  ;;  %v1135_v2 = vpop.f32.mrf.mxu3 }
 0x2e4   : > { %v1126_v3 = vadd.f32 %v1736_v58, %v1125_v60  ;;  %v1136_v6 = vadd.f32 %v1736_v58, %v1135_v2  ;;  %v1107_v10 = vpop.f32.mrf.mxu0  ;;  %v1117_v36 = vpop.f32.mrf.mxu1 }
 0x2e5   : > { %v1108_v38 = vadd.f32 %v1736_v58, %v1107_v10  ;;  %v1118_v37 = vadd.f32 %v1736_v58, %v1117_v36 }
 0x2e6   : > { %v1150_v41 = vadd.f32 %v1126_v3, %v2243_v18  ;;  %v1154_v47 = vadd.f32 %v1136_v6, %v2259_v29 }
 0x2e7   : > { %v1143_v43 = vadd.f32 %v1108_v38, %v2241_v17  ;;  %v1147_v48 = vadd.f32 %v1118_v37, %v2257_v28 }
 0x2e8   : > { %1167 = vst [vmem:[%s1980_s19 + $0x50] sm:$0xff] %v1150_v41 }
 0x2e9   : > { %1171 = vst [vmem:[%s1980_s19 + $0x70] sm:$0xff] %v1154_v47 }
 0x2ea   : > { %1160 = vst [vmem:[%s1980_s19 + $0x18] sm:$0xff] %v1143_v43 }
 0x2eb   : > { %1164 = vst [vmem:[%s1980_s19 + $0x38] sm:$0xff] %v1147_v48  ;;  %v1127_v49 = vpop.f32.mrf.mxu2  ;;  %v1137_v52 = vpop.f32.mrf.mxu3 }
 0x2ec   : > { %v1128_v56 = vadd.f32 %v1736_v58, %v1127_v49  ;;  %v1138_v60 = vadd.f32 %v1736_v58, %v1137_v52 }
 0x2ee   : > { %v1151_v2 = vadd.f32 %v1128_v56, %v2247_v20  ;;  %v1155_v10 = vadd.f32 %v1138_v60, %v2263_v31 }
 0x2f0   : > { %1168 = vst [vmem:[%s1980_s19 + $0x58] sm:$0xff] %v1151_v2 }
 0x2f1   : > { %1172 = vst [vmem:[%s1980_s19 + $0x78] sm:$0xff] %v1155_v10 }
 0x2f2 PF: > { %p1608_p5 = scmp.le.s32.totalorder %s1815_s24, 0 }
 0x2f4   : > { %1176 = sbr.rel (%p1608_p5) target bundleno = 780 (0x30c), region = 64 }
 0x2f9   : > { %v1178_v58 = vld [vmem:[%s1980_s19] sm:$0xff]  ;;  %v1179_v3 = vld [vmem:[%s1980_s19 + $0x8] sm:$0xff]  ;;  %v1180_v6 = vld [vmem:[%s1980_s19 + $0x10] sm:$0xff] }
 0x2fa   : > { %v1194_v36 = vadd.f32 %v1178_v58, %v2235_v11  ;;  %v1195_v38 = vadd.f32 %v1179_v3, %v2237_v14  ;;  %v1196_v37 = vadd.f32 %v1180_v6, %v2239_v15  ;;  %v1181_v41 = vld [vmem:[%s1980_s19 + $0x18] sm:$0xff]  ;;  %v1182_v47 = vld [vmem:[%s1980_s19 + $0x20] sm:$0xff]  ;;  %v1183_v43 = vld [vmem:[%s1980_s19 + $0x28] sm:$0xff] }
 0x2fb   : > { %v1197_v48 = vadd.f32 %v1181_v41, %v2241_v17  ;;  %v1184_v49 = vld [vmem:[%s1980_s19 + $0x30] sm:$0xff]  ;;  %v1198_v52 = vadd.f32 %v1182_v47, %v2245_v19  ;;  %v1185_v11 = vld [vmem:[%s1980_s19 + $0x38] sm:$0xff]  ;;  %v1199_v14 = vadd.f32 %v1183_v43, %v2249_v21  ;;  %v1186_v15 = vld [vmem:[%s1980_s19 + $0x40] sm:$0xff] }
 0x2fc   : > { %1210 = vst [vmem:[%s1980_s19] sm:$0xff] %v1194_v36  ;;  %v1200_v56 = vadd.f32 %v1184_v49, %v2253_v24  ;;  %v1187_v17 = vld [vmem:[%s1980_s19 + $0x48] sm:$0xff]  ;;  %v1201_v60 = vadd.f32 %v1185_v11, %v2257_v28  ;;  %v1188_v19 = vld [vmem:[%s1980_s19 + $0x50] sm:$0xff]  ;;  %v1202_v2 = vadd.f32 %v1186_v15, %v2261_v30  ;;  %v1189_v21 = vld [vmem:[%s1980_s19 + $0x58] sm:$0xff] }
 0x2fd   : > { %1211 = vst [vmem:[%s1980_s19 + $0x8] sm:$0xff] %v1195_v38  ;;  %v1203_v10 = vadd.f32 %v1187_v17, %v2265_v34  ;;  %v1190_v58 = vld [vmem:[%s1980_s19 + $0x60] sm:$0xff]  ;;  %v1204_v24 = vadd.f32 %v1188_v19, %v2243_v18  ;;  %v1191_v28 = vld [vmem:[%s1980_s19 + $0x68] sm:$0xff]  ;;  %v1205_v3 = vadd.f32 %v1189_v21, %v2247_v20  ;;  %v1192_v6 = vld [vmem:[%s1980_s19 + $0x70] sm:$0xff] }
 0x2fe   : > { %1212 = vst [vmem:[%s1980_s19 + $0x10] sm:$0xff] %v1196_v37  ;;  %v1206_v30 = vadd.f32 %v1190_v58, %v2251_v22  ;;  %v1193_v36 = vld [vmem:[%s1980_s19 + $0x78] sm:$0xff]  ;;  %v1207_v34 = vadd.f32 %v1191_v28, %v2255_v27  ;;  %v1208_v38 = vadd.f32 %v1192_v6, %v2259_v29 }
 0x2ff   : > { %1213 = vst [vmem:[%s1980_s19 + $0x18] sm:$0xff] %v1197_v48  ;;  %v1209_v18 = vadd.f32 %v1193_v36, %v2263_v31 }
 0x300   : > { %1214 = vst [vmem:[%s1980_s19 + $0x20] sm:$0xff] %v1198_v52 }
 0x301   : > { %1215 = vst [vmem:[%s1980_s19 + $0x28] sm:$0xff] %v1199_v14 }
 0x302   : > { %1216 = vst [vmem:[%s1980_s19 + $0x30] sm:$0xff] %v1200_v56 }
 0x303   : > { %1217 = vst [vmem:[%s1980_s19 + $0x38] sm:$0xff] %v1201_v60 }
 0x304   : > { %1218 = vst [vmem:[%s1980_s19 + $0x40] sm:$0xff] %v1202_v2 }
 0x305   : > { %1219 = vst [vmem:[%s1980_s19 + $0x48] sm:$0xff] %v1203_v10 }
 0x306   : > { %1220 = vst [vmem:[%s1980_s19 + $0x50] sm:$0xff] %v1204_v24 }
 0x307   : > { %1221 = vst [vmem:[%s1980_s19 + $0x58] sm:$0xff] %v1205_v3 }
 0x308   : > { %1222 = vst [vmem:[%s1980_s19 + $0x60] sm:$0xff] %v1206_v30 }
 0x309   : > { %1223 = vst [vmem:[%s1980_s19 + $0x68] sm:$0xff] %v1207_v34 }
 0x30a   : > { %1224 = vst [vmem:[%s1980_s19 + $0x70] sm:$0xff] %v1208_v38 }
 0x30b   : > { %1225 = vst [vmem:[%s1980_s19 + $0x78] sm:$0xff] %v1209_v18 }
 0x30c PF: > { %s1226_s16 = sadd.s32 1, %s1815_s24 }
 0x30d   : > { %p1609_p6 = scmp.ge.s32.totalorder %s1226_s16, 2 }
 0x30e   : > { %p1231_p7 = scmp.lt.s32.totalorder (!%p1609_p6), %s1226_s16, 0  ;;  %s1232_s20 = ssub.s32 (!%p1609_p6), 0, %s1226_s16 }
 0x30f   : > { %1230 = sbr.rel (%p1609_p6) target bundleno = 812 (0x32c), region = 68  ;;  %s1610_s12 = smin.u32 (!%p1609_p6), %s1232_s20, %s1226_s16 }
 0x310   : > { %s1234_s18 = sand.u32 (!%p1609_p6), 1, %s1610_s12  }
 0x311   : > { %s1235_s14 = ssub.s32 (!%p1609_p6), 0, %s1234_s18 }
 0x314   : > { %s2610_s14 = smov (!%p1231_p7, %s1235_s14), %s1234_s18  ;;  %v1245_v20 = vmul.f32 %v2125_v44, %v2116_v32  ;;  %v1246_v22 = vmul.f32 %v2128_v45, %v2121_v42  ;;  %v1247_v27 = vmul.f32 %v2144_v0, %v2133_v51  ;;  %v1248_v29 = vmul.f32 %v2147_v1, %v2140_v62 }
 0x315   : > { %p1612_p8 = scmp.lt.s32.totalorder %s2610_s14, 0  ;;  %s1241_s30 = sadd.s32 2, %s2610_s14  ;;  %v1249_v37 = vmul.f32 %v2172_v25, %v2164_v16  ;;  %vm1281_vm2 = vcmask 257024   ;;  %v1250_v32 = vmul.f32 %v2175_v26, %v2168_v23  ;;  %v1251_v44 = vmul.f32 %v2201_v53, %v2195_v46 }
 0x316   : > { %v1261_v31 = vpack.c.bf16 %v1245_v20, %v1245_v20  ;;  %v1262_v41 = vpack.c.bf16 %v1246_v22, %v1246_v22  ;;  %v1263_v42 = vpack.c.bf16 %v1247_v27, %v1247_v27  ;;  %v1264_v45 = vpack.c.bf16 %v1248_v29, %v1248_v29 }
 0x317   : > { %s2612_s30 = smov (!%p1612_p8, %s1241_s30), %s2610_s14  ;;  %v1252_v51 = vmul.f32 %v2204_v54, %v2198_v50  ;;  %v1265_v62 = vpack.c.bf16 %v1249_v37, %v1249_v37  ;;  %v1253_v0 = vmul.f32 %v2230_v9, %v2224_v5  ;;  %v1266_v1 = vpack.c.bf16 %v1250_v32, %v1250_v32 }
 0x318   : > { %s1613_s11 = sshll.u32 %s2612_s30, 7  ;;  %v1254_v16 = vmul.f32 %v2227_v7, %v2222_v4  ;;  %v1267_v23 = vpack.c.bf16 %v1251_v44, %v1251_v44  ;;  %v1255_v25 = vmul.f32 %v2156_v12, %v2137_v55  ;;  %v1256_v46 = vmul.f32 %v2159_v13, %v2152_v8 }
 0x319   : > { %s1277_s29 = sshra.s32 %s1613_s11, 3  ;;  %v1268_v26 = vpack.c.bf16 %v1252_v51, %v1252_v51  ;;  %v1269_v50 = vpack.c.bf16 %v1253_v0, %v1253_v0  ;;  %v1257_v53 = vmul.f32 %v2186_v39, %v2182_v35  ;;  %v1258_v55 = vmul.f32 %v2189_v40, %v2179_v33 }
 0x31a   : > { %s1614_s0 = sshll.u32 %s1277_s29, 2  ;;  %v1270_v54 = vpack.c.bf16 %v1254_v16, %v1254_v16  ;;  %v1271_v8 = vpack.c.bf16 %v1255_v25, %v1255_v25  ;;  %v1259_v12 = vmul.f32 %v2214_v61, %v2208_v57  ;;  %v1272_v13 = vpack.c.bf16 %v1256_v46, %v1256_v46 }
 0x31b   : > { %s2429_s21 = scalar_lea.vmem [#allocation2], %s1614_s0  ;;  %v1260_v35 = vmul.f32 %v2217_v63, %v2211_v59  ;;  %v1273_v39 = vpack.c.bf16 %v1257_v53, %v1257_v53  ;;  %v1274_v33 = vpack.c.bf16 %v1258_v55, %v1258_v55 }
 0x31c   : > { %1282 = vst.msk [vmem:[%s2429_s21] sm:$0xf] %vm1281_vm2, %v1261_v31  ;;  %v1275_v40 = vpack.c.bf16 %v1259_v12, %v1259_v12 }
 0x31d   : > { %1283 = vst.msk [vmem:[%s2429_s21 + $0x4] sm:$0xf] %vm1281_vm2, %v1262_v41  ;;  %v1276_v4 = vpack.c.bf16 %v1260_v35, %v1260_v35 }
 0x31e   : > { %1284 = vst.msk [vmem:[%s2429_s21 + $0x8] sm:$0xf] %vm1281_vm2, %v1263_v42 }
 0x31f   : > { %1285 = vst.msk [vmem:[%s2429_s21 + $0xc] sm:$0xf] %vm1281_vm2, %v1264_v45 }
 0x320   : > { %1286 = vst.msk [vmem:[%s2429_s21 + $0x10] sm:$0xf] %vm1281_vm2, %v1265_v62 }
 0x321   : > { %1287 = vst.msk [vmem:[%s2429_s21 + $0x14] sm:$0xf] %vm1281_vm2, %v1266_v1 }
 0x322   : > { %1288 = vst.msk [vmem:[%s2429_s21 + $0x18] sm:$0xf] %vm1281_vm2, %v1267_v23 }
 0x323   : > { %1289 = vst.msk [vmem:[%s2429_s21 + $0x1c] sm:$0xf] %vm1281_vm2, %v1268_v26 }
 0x324   : > { %1290 = vst.msk [vmem:[%s2429_s21 + $0x20] sm:$0xf] %vm1281_vm2, %v1269_v50 }
 0x325   : > { %1291 = vst.msk [vmem:[%s2429_s21 + $0x24] sm:$0xf] %vm1281_vm2, %v1270_v54 }
 0x326   : > { %1292 = vst.msk [vmem:[%s2429_s21 + $0x28] sm:$0xf] %vm1281_vm2, %v1271_v8 }
 0x327   : > { %1293 = vst.msk [vmem:[%s2429_s21 + $0x2c] sm:$0xf] %vm1281_vm2, %v1272_v13 }
 0x328   : > { %1294 = vst.msk [vmem:[%s2429_s21 + $0x30] sm:$0xf] %vm1281_vm2, %v1273_v39 }
 0x329   : > { %1295 = vst.msk [vmem:[%s2429_s21 + $0x34] sm:$0xf] %vm1281_vm2, %v1274_v33 }
 0x32a   : > { %1296 = vst.msk [vmem:[%s2429_s21 + $0x38] sm:$0xf] %vm1281_vm2, %v1275_v40 }
 0x32b   : > { %1297 = vst.msk [vmem:[%s2429_s21 + $0x3c] sm:$0xf] %vm1281_vm2, %v1276_v4 }
 0x32c PF: > { %p1615_p10 = scmp.ne.s32.totalorder %s1815_s24, 1 }
 0x32e   : > { %1301 = sbr.rel (%p1615_p10) target bundleno = 838 (0x346), region = 72 }
 0x333   : > { %v1303_v57 = vld [vmem:[%s1980_s19] sm:$0xff]  ;;  %v1304_v59 = vld [vmem:[%s1980_s19 + $0x8] sm:$0xff]  ;;  %v1305_v61 = vld [vmem:[%s1980_s19 + $0x10] sm:$0xff] }
 0x334   : > { %v1319_v63 = vmax.f32 %v1303_v57, 0.0  ;;  %v1320_v5 = vmax.f32 %v1304_v59, 0.0  ;;  %v1321_v7 = vmax.f32 %v1305_v61, 0.0  ;;  %v1306_v9 = vld [vmem:[%s1980_s19 + $0x18] sm:$0xff]  ;;  %v1307_v47 = vld [vmem:[%s1980_s19 + $0x20] sm:$0xff]  ;;  %v1308_v43 = vld [vmem:[%s1980_s19 + $0x28] sm:$0xff] }
 0x335   : > { %v1322_v48 = vmax.f32 %v1306_v9, 0.0  ;;  %v1309_v49 = vld [vmem:[%s1980_s19 + $0x30] sm:$0xff]  ;;  %v1323_v52 = vmax.f32 %v1307_v47, 0.0  ;;  %v1310_v11 = vld [vmem:[%s1980_s19 + $0x38] sm:$0xff]  ;;  %v1324_v14 = vmax.f32 %v1308_v43, 0.0  ;;  %v1311_v15 = vld [vmem:[%s1980_s19 + $0x40] sm:$0xff] }
 0x336   : > { %1335 = vst [vmem:[%s1980_s19] sm:$0xff] %v1319_v63  ;;  %v1325_v56 = vmax.f32 %v1309_v49, 0.0  ;;  %v1312_v17 = vld [vmem:[%s1980_s19 + $0x48] sm:$0xff]  ;;  %v1326_v60 = vmax.f32 %v1310_v11, 0.0  ;;  %v1313_v19 = vld [vmem:[%s1980_s19 + $0x50] sm:$0xff]  ;;  %v1327_v2 = vmax.f32 %v1311_v15, 0.0  ;;  %v1314_v21 = vld [vmem:[%s1980_s19 + $0x58] sm:$0xff] }
 0x337   : > { %1336 = vst [vmem:[%s1980_s19 + $0x8] sm:$0xff] %v1320_v5  ;;  %v1328_v10 = vmax.f32 %v1312_v17, 0.0  ;;  %v1315_v58 = vld [vmem:[%s1980_s19 + $0x60] sm:$0xff]  ;;  %v1329_v24 = vmax.f32 %v1313_v19, 0.0  ;;  %v1316_v28 = vld [vmem:[%s1980_s19 + $0x68] sm:$0xff]  ;;  %v1330_v3 = vmax.f32 %v1314_v21, 0.0 }
 0x338   : > { %1337 = vst [vmem:[%s1980_s19 + $0x10] sm:$0xff] %v1321_v7  ;;  %v1317_v6 = vld [vmem:[%s1980_s19 + $0x70] sm:$0xff]  ;;  %v1331_v30 = vmax.f32 %v1315_v58, 0.0  ;;  %v1318_v36 = vld [vmem:[%s1980_s19 + $0x78] sm:$0xff]  ;;  %v1332_v34 = vmax.f32 %v1316_v28, 0.0 }
 0x339   : > { %1338 = vst [vmem:[%s1980_s19 + $0x18] sm:$0xff] %v1322_v48  ;;  %v1333_v38 = vmax.f32 %v1317_v6, 0.0  ;;  %v1334_v18 = vmax.f32 %v1318_v36, 0.0 }
 0x33a   : > { %1339 = vst [vmem:[%s1980_s19 + $0x20] sm:$0xff] %v1323_v52 }
 0x33b   : > { %1340 = vst [vmem:[%s1980_s19 + $0x28] sm:$0xff] %v1324_v14 }
 0x33c   : > { %1341 = vst [vmem:[%s1980_s19 + $0x30] sm:$0xff] %v1325_v56 }
 0x33d   : > { %1342 = vst [vmem:[%s1980_s19 + $0x38] sm:$0xff] %v1326_v60 }
 0x33e   : > { %1343 = vst [vmem:[%s1980_s19 + $0x40] sm:$0xff] %v1327_v2 }
 0x33f   : > { %1344 = vst [vmem:[%s1980_s19 + $0x48] sm:$0xff] %v1328_v10 }
 0x340   : > { %1345 = vst [vmem:[%s1980_s19 + $0x50] sm:$0xff] %v1329_v24 }
 0x341   : > { %1346 = vst [vmem:[%s1980_s19 + $0x58] sm:$0xff] %v1330_v3 }
 0x342   : > { %1347 = vst [vmem:[%s1980_s19 + $0x60] sm:$0xff] %v1331_v30 }
 0x343   : > { %1348 = vst [vmem:[%s1980_s19 + $0x68] sm:$0xff] %v1332_v34 }
 0x344   : > { %1349 = vst [vmem:[%s1980_s19 + $0x70] sm:$0xff] %v1333_v38 }
 0x345   : > { %1350 = vst [vmem:[%s1980_s19 + $0x78] sm:$0xff] %v1334_v18 }
 0x346 PF: > { %s1637_s24 = sshll.u32 %s1819_s25, 7  ;;  %s1364_s13 = sshll.u32 %s1980_s19, 4  ;;  %s1365_s13 = int_to_ptr.vmem [resolvable:$true] %s1364_s13 }
 0x347   : > { %s1363_s27 = scalar_lea.hbm %s2563_s6, %s1637_s24  ;;  %s2586_s7 = sand.u32 1, %s1807_s22  }
 0x348   : > { %s1366_s28 = sshll.u32 %s1363_s27, 4  ;;  %s1352_s8 = scalar_lea.sflag [#allocation5], %s2586_s7  ;;  %s1367_s28 = int_to_ptr.hbm [resolvable:$true] %s1366_s28 }
 0x349   : > { %s1751_s10 = sshra.s32 %s1367_s28, 4  ;;  %s1757_s25 = scalar_lea.hbm %s2563_s6, 256  ;;  %s1752_s10 = int_to_ptr.hbm [resolvable:$true] %s1751_s10 }
 0x34a   : > { %s1753_s15 = scalar_lea.hbm %s1752_s10, 128  ;;  %p1758_p0 = scmp.lt.s32.totalorder %s1752_s10, %s2563_s6 }
 0x34b   : > { %p1754_p11 = scmp.ne.s32.totalorder %s1752_s10, %s1753_s15  ;;  %p1759_p1 = scmp.lt.s32.totalorder %s1757_s25, %s1753_s15 }
 0x34d   : > { %p1755_p12 = pnand %p1754_p11, %p1922_p3  ;;  %p1760_p2 = por %p1759_p1, %p1758_p0 }
 0x34f   : > { %p1756_p13 = pneg %p1755_p12 }
 0x351   : > { %p1761_p4 = pnand %p1760_p2, %p1756_p13 }
 0x353   : > { %1764 = shalt.err (!%p1761_p4)
}
 0x354   : > { %s1836_s19 = smov 128   ;;  %s1837_s18 = smov 8  }
 0x355   : > { %1654 = dma.vmem_to_hbm [thread:$0]  (%p1922_p3), %s1365_s13, 2048, %s1367_s28, %s1352_s8, %s1836_s19, %s1836_s19, %s1837_s18  }
 0x356 PF: > { %s2587_s14 = sld [smem:[#allocation11_spill]] }
 0x357   : > { %s2588_s30 = sld [smem:[#allocation7_spill]] }
 0x35c   : > { %p1660_p5 = scmp.ge.s32.totalorder %s2587_s14, 2 }
 0x35d   : > { %s1381_s29 = sand.u32 1, %s2588_s30  }
 0x35e   : > { %p1657_p6 = pnand %p1660_p5, %p1932_p9  ;;  %s1382_s0 = scalar_lea.sflag [#allocation5], %s1381_s29 }
 0x360   : > { %p1658_p7 = pneg %p1657_p6 }
 0x362   : > { %1798 = dma.done.wait (%p1658_p7), %s1382_s0, 2048  }
 0x363   : > { %1800 = vsyncadd (%p1658_p7), %s1382_s0, 4294965248  ;;  %s19_s28 = sadd.s32 1, %s2587_s14   ;;  %s2590_s24 = sld [smem:[#allocation8_spill]] }
 0x364   : > { %p16_p8 = scmp.ge.s32.totalorder %s19_s28, 6   ;;  %s2591_s23 = sld [smem:[#allocation15_spill]] }
 0x365   : > { %s2592_s9 = sld [smem:[#allocation9_spill]]  ;;  %s2596_s21 = smov %s1807_s22 }
 0x366   : > { %s2593_s25 = sld [smem:[#allocation10_spill]] }
 0x367   : > { %s2594_s26 = sld [smem:[#allocation12_spill]]  ;;  %18 = sbr.rel (!%p16_p8) target bundleno = 7 (0x7), region = 130 }
 0x368   : > { %s2595_s27 = sld [smem:[#allocation13_spill]] }
 0x369   : > { %s2597_s22 = smov %s2590_s24 }
 0x36b   : > { %s2598_s24 = smov %s2592_s9 }
 0x36c   :  { %1388 = vsyncpa [#allocation5], 1 }
 0x36d   :  { %1390 = vsyncpa [#allocation5 + $0x1], 1 }

</bundles_post_ra>
